<compile_context>
chip_gen: v6e
topology: v6e:2x2x1
jax: 0.10.0
libtpu: 0.0.40
codegen_flags: <defaults>
</compile_context>

<pallas_src>
import functools

import jax
import jax.numpy as jnp
from jax.experimental import pallas as pl
from jax.experimental.pallas import tpu as pltpu

_BN_EPS = 1e-5


def _round_up(x, m):
    return (x + m - 1) // m * m


def _linear_model_kernel(
    x_ref,                                                  # (TM, n_in) bf16 activation tile
    w0_ref, w1a_ref, w1b_ref, w2a_ref, w2b_ref, wout_ref,   # bf16 folded weights [in, out]
    b_ref,                                                  # (8, BW) f32 packed biases (rows 0..5)
    o_ref,                                                  # (TM, OUT_PAD) f32 output tile
):
    h_pad = w0_ref.shape[1]
    out_pad = wout_ref.shape[1]

    # Hoist all bias rows: one (8,128) f32 load (exactly one vreg), sliced once.
    biases = b_ref[...]
    b0 = biases[0:1, :h_pad]
    b1 = biases[1:2, :h_pad]
    b2 = biases[2:3, :h_pad]
    b3 = biases[3:4, :h_pad]
    b4 = biases[4:5, :h_pad]
    b5 = biases[5:6, :out_pad]

    x = x_ref[...]  # bf16

    def linear_relu(h_bf16, w_ref, bias):
        # bf16 x bf16 -> f32 accumulation on the MXU; bias + ReLU in f32 on the VPU.
        z = jnp.dot(h_bf16, w_ref[...], preferred_element_type=jnp.float32)
        return jnp.maximum(z + bias, 0.0)

    # head: relu(bn1(fc1(x)))  (BN folded into w0/b0)
    y = linear_relu(x, w0_ref, b0)

    # residual stage 0
    z = linear_relu(y.astype(jnp.bfloat16), w1a_ref, b1)
    z = linear_relu(z.astype(jnp.bfloat16), w1b_ref, b2)
    y = y + z

    # residual stage 1
    z = linear_relu(y.astype(jnp.bfloat16), w2a_ref, b3)
    z = linear_relu(z.astype(jnp.bfloat16), w2b_ref, b4)
    y = y + z

    # output fc2 (no BN / ReLU), lane-dense (TM, OUT_PAD) store
    o_ref[...] = (
        jnp.dot(y.astype(jnp.bfloat16), wout_ref[...],
                preferred_element_type=jnp.float32)
        + b5
    )


def make_params(key, n_input, n_hidden, n_output, weight_dtype=jnp.bfloat16):
    """PyTorch-style init + non-trivial BN running stats.

    Returns (kernel_params, raw_params):
      kernel_params: BN folded into the preceding Linear, hidden/output dims
        zero-padded to 128 lanes, weights cast to bf16, all 6 biases packed
        into a single (8, 128) f32 array.
      raw_params: unfolded f32 parameters for a pure-f32 PyTorch-eval reference.
    """
    h_pad = _round_up(n_hidden, 128)
    out_pad = _round_up(n_output, 128)
    bw = max(h_pad, out_pad)

    def linear(k, fan_in, fan_out):
        kw, kb = jax.random.split(k)
        bound = 1.0 / jnp.sqrt(float(fan_in))
        w = jax.random.uniform(kw, (fan_in, fan_out), jnp.float32, -bound, bound)
        b = jax.random.uniform(kb, (fan_out,), jnp.float32, -bound, bound)
        return w, b

    def batchnorm(k, n):
        # Non-trivial eval-mode running stats so BN folding is actually exercised.
        k1, k2, k3, k4 = jax.random.split(k, 4)
        gamma = jax.random.uniform(k1, (n,), jnp.float32, 0.5, 1.5)
        beta = 0.1 * jax.random.normal(k2, (n,), jnp.float32)
        mean = 0.5 * jax.random.normal(k3, (n,), jnp.float32)
        var = jax.random.uniform(k4, (n,), jnp.float32, 0.5, 1.5)
        return gamma, beta, mean, var

    def fold(lin_p, bn_p):
        w, b = lin_p
        gamma, beta, mean, var = bn_p
        scale = gamma / jnp.sqrt(var + _BN_EPS)
        shift = beta - mean * scale
        return w * scale[None, :], b * scale + shift

    def pad_w(w, rows, cols):
        out = jnp.zeros((rows, cols), jnp.float32).at[: w.shape[0], : w.shape[1]].set(w)
        return out.astype(weight_dtype)

    def pad_b(b):
        return jnp.zeros((bw,), jnp.float32).at[: b.shape[0]].set(b)

    keys = jax.random.split(key, 11)
    fc1 = linear(keys[0], n_input, n_hidden)
    bn1 = batchnorm(keys[1], n_hidden)
    s0a = linear(keys[2], n_hidden, n_hidden)
    bn0a = batchnorm(keys[3], n_hidden)
    s0b = linear(keys[4], n_hidden, n_hidden)
    bn0b = batchnorm(keys[5], n_hidden)
    s1a = linear(keys[6], n_hidden, n_hidden)
    bn1a = batchnorm(keys[7], n_hidden)
    s1b = linear(keys[8], n_hidden, n_hidden)
    bn1b = batchnorm(keys[9], n_hidden)
    fc2 = linear(keys[10], n_hidden, n_output)  # no BN on the output layer

    raw_params = dict(
        fc1=fc1, bn1=bn1,
        stages=[dict(fc_a=s0a, bn_a=bn0a, fc_b=s0b, bn_b=bn0b),
                dict(fc_a=s1a, bn_a=bn1a, fc_b=s1b, bn_b=bn1b)],
        fc2=fc2,
    )

    w0, b0 = fold(fc1, bn1)
    w1a, b1a = fold(s0a, bn0a)
    w1b, b1b = fold(s0b, bn0b)
    w2a, b2a = fold(s1a, bn1a)
    w2b, b2b = fold(s1b, bn1b)
    wout, bout = fc2

    kernel_params = (
        pad_w(w0, n_input, h_pad),        # input dim left un-padded (full-extent K block)
        pad_w(w1a, h_pad, h_pad),
        pad_w(w1b, h_pad, h_pad),
        pad_w(w2a, h_pad, h_pad),
        pad_w(w2b, h_pad, h_pad),
        pad_w(wout, h_pad, out_pad),
        jnp.stack(                        # (8, bw): single lane/sublane-aligned DMA
            [pad_b(b0), pad_b(b1a), pad_b(b1b), pad_b(b2a), pad_b(b2b), pad_b(bout),
             jnp.zeros((bw,), jnp.float32), jnp.zeros((bw,), jnp.float32)],
            axis=0,
        ),
    )
    return kernel_params, raw_params


@functools.partial(jax.jit, static_argnames=("n_output", "max_tile_rows"))
def linear_model_forward(x, params, n_output, max_tile_rows=512):
    w0, w1a, w1b, w2a, w2b, wout, biases = params
    batch, n_in = x.shape
    assert w0.shape[0] == n_in, "fc1 weight rows must match input feature dim"
    h_pad = w0.shape[1]
    out_pad = wout.shape[1]

    # Batch tile: large (amortizes ~0.35us/step overhead), multiple of 16 for
    # bf16 sublane packing.  Sweep 256/512/1024 per chip; v5e may prefer 256.
    tm = min(max_tile_rows, _round_up(batch, 16))
    b_pad = _round_up(batch, tm)
    grid = (pl.cdiv(b_pad, tm),)

    # Input stays bf16 and un-padded in the feature dim; only pad batch rows.
    x_bf = x.astype(jnp.bfloat16)
    if b_pad != batch:
        x_bf = jnp.zeros((b_pad, n_in), jnp.bfloat16).at[:batch, :].set(x_bf)

    weight_arrays = (w0, w1a, w1b, w2a, w2b, wout)

    # Activation/output tiled over the batch grid; weights + biases resident.
    x_spec = pl.BlockSpec((tm, n_in), lambda i: (i, 0))
    weight_specs = [pl.BlockSpec(w.shape, lambda i: (0, 0)) for w in weight_arrays]
    bias_spec = pl.BlockSpec(biases.shape, lambda i: (0, 0))
    out_spec = pl.BlockSpec((tm, out_pad), lambda i: (i, 0))

    flops = 2 * b_pad * (n_in * h_pad + 4 * h_pad * h_pad + h_pad * out_pad)
    bytes_accessed = (
        x_bf.size * 2                          # bf16 input
        + b_pad * out_pad * 4                  # f32 output
        + sum(w.size * 2 for w in weight_arrays)
        + biases.size * 4
    )
    cost = pl.CostEstimate(flops=flops, transcendentals=0,
                           bytes_accessed=bytes_accessed)

    out_padded = pl.pallas_call(
        _linear_model_kernel,
        out_shape=jax.ShapeDtypeStruct((b_pad, out_pad), jnp.float32),
        grid=grid,
        in_specs=[x_spec] + weight_specs + [bias_spec],
        out_specs=out_spec,
        compiler_params=pltpu.CompilerParams(
            dimension_semantics=("parallel",),   # megacore sharding on v7x
        ),
        cost_estimate=cost,
    )(x_bf, *weight_arrays, biases)

    return out_padded[:batch, :n_output]


def reference_forward_folded(x, kernel_params, n_output):
    """Pure-JAX reference using the same folded/padded bf16 parameters (validates lowering)."""
    w0, w1a, w1b, w2a, w2b, wout, biases = kernel_params
    h_pad = w0.shape[1]
    out_pad = wout.shape[1]

    def lr(h, w, row, width):
        z = jnp.dot(h.astype(jnp.bfloat16), w, preferred_element_type=jnp.float32)
        return jnp.maximum(z + biases[row:row + 1, :width], 0.0)

    y = lr(x, w0, 0, h_pad)
    z = lr(y, w1a, 1, h_pad)
    z = lr(z, w1b, 2, h_pad)
    y = y + z
    z = lr(y, w2a, 3, h_pad)
    z = lr(z, w2b, 4, h_pad)
    y = y + z
    out = (
        jnp.dot(y.astype(jnp.bfloat16), wout, preferred_element_type=jnp.float32)
        + biases[5:6, :out_pad]
    )
    return out[:, :n_output]


def reference_forward_f32(x, raw_params):
    """Unfolded pure-f32 reference mirroring the PyTorch eval-mode forward."""
    def bn(v, p):
        gamma, beta, mean, var = p
        return (v - mean) / jnp.sqrt(var + _BN_EPS) * gamma + beta

    def lin(v, p):
        w, b = p
        return v @ w + b

    y = jax.nn.relu(bn(lin(x, raw_params["fc1"]), raw_params["bn1"]))
    for stage in raw_params["stages"]:
        z = jax.nn.relu(bn(lin(y, stage["fc_a"]), stage["bn_a"]))
        z = jax.nn.relu(bn(lin(z, stage["fc_b"]), stage["bn_b"]))
        y = y + z
    return lin(y, raw_params["fc2"])


if __name__ == "__main__":
    n_input, n_hidden, n_output = 16, 32, 16
    batch = 256  # exercises the batch-tiled grid and lane-dense stores

    key = jax.random.PRNGKey(0)
    kx, kp = jax.random.split(key)
    x = jax.random.normal(kx, (batch, n_input), jnp.float32)
    kernel_params, raw_params = make_params(kp, n_input, n_hidden, n_output)

    out = linear_model_forward(x, kernel_params, n_output)
    out = jax.block_until_ready(out)
    assert out.shape == (batch, n_output)

    # 1) Tight check vs. a pure-JAX reference using the exact same folded/bf16 params.
    ref_folded = reference_forward_folded(x, kernel_params, n_output)
    assert jnp.allclose(out, ref_folded, atol=1e-2, rtol=1e-2), \
        "mismatch vs folded-bf16 JAX reference"

    # 2) Loose check vs. the unfolded pure-f32 PyTorch-eval math (validates BN folding;
    #    slack covers bf16 weight/activation quantization).
    ref_f32 = reference_forward_f32(x, raw_params)
    assert jnp.allclose(out, ref_f32, atol=1e-1, rtol=5e-2), \
        "mismatch vs unfolded f32 reference"

    print("KERNEL_OK")
</pallas_src>

<mosaic_0001>
module attributes {stable_mosaic.version = 11 : i64} {
  func.func @_linear_model_kernel(%arg0: i32, %arg1: memref<256x16xbf16, #tpu.memory_space<vmem>>, %arg2: memref<16x128xbf16, #tpu.memory_space<vmem>>, %arg3: memref<128x128xbf16, #tpu.memory_space<vmem>>, %arg4: memref<128x128xbf16, #tpu.memory_space<vmem>>, %arg5: memref<128x128xbf16, #tpu.memory_space<vmem>>, %arg6: memref<128x128xbf16, #tpu.memory_space<vmem>>, %arg7: memref<128x128xbf16, #tpu.memory_space<vmem>>, %arg8: memref<8x128xf32, #tpu.memory_space<vmem>>, %arg9: memref<256x128xf32, #tpu.memory_space<vmem>>) attributes {dimension_semantics = [#tpu.dimension_semantics<parallel>], iteration_bounds = array<i64: 1>, scalar_prefetch = 0 : i64, scratch_operands = 0 : i64, tpu.core_type = #tpu.core_type<tc>, window_params = [{transform_indices = @transform_0, window_bounds = array<i64: 256, 16>}, {pipeline_mode = #tpu.pipeline_mode<synchronous>, transform_indices = @transform_1, window_bounds = array<i64: 16, 128>}, {pipeline_mode = #tpu.pipeline_mode<synchronous>, transform_indices = @transform_2, window_bounds = array<i64: 128, 128>}, {pipeline_mode = #tpu.pipeline_mode<synchronous>, transform_indices = @transform_3, window_bounds = array<i64: 128, 128>}, {pipeline_mode = #tpu.pipeline_mode<synchronous>, transform_indices = @transform_4, window_bounds = array<i64: 128, 128>}, {pipeline_mode = #tpu.pipeline_mode<synchronous>, transform_indices = @transform_5, window_bounds = array<i64: 128, 128>}, {pipeline_mode = #tpu.pipeline_mode<synchronous>, transform_indices = @transform_6, window_bounds = array<i64: 128, 128>}, {pipeline_mode = #tpu.pipeline_mode<synchronous>, transform_indices = @transform_7, window_bounds = array<i64: 8, 128>}, {transform_indices = @transform_8, window_bounds = array<i64: 256, 128>}]} {
    %c0 = arith.constant 0 : index
    %c0_0 = arith.constant 0 : index
    %0 = vector.load %arg8[%c0, %c0_0] : memref<8x128xf32, #tpu.memory_space<vmem>>, vector<8x128xf32>
    %1 = vector.extract_strided_slice %0 {offsets = [0, 0], sizes = [1, 128], strides = [1, 1]} : vector<8x128xf32> to vector<1x128xf32>
    %2 = vector.extract_strided_slice %0 {offsets = [1, 0], sizes = [1, 128], strides = [1, 1]} : vector<8x128xf32> to vector<1x128xf32>
    %3 = vector.extract_strided_slice %0 {offsets = [2, 0], sizes = [1, 128], strides = [1, 1]} : vector<8x128xf32> to vector<1x128xf32>
    %4 = vector.extract_strided_slice %0 {offsets = [3, 0], sizes = [1, 128], strides = [1, 1]} : vector<8x128xf32> to vector<1x128xf32>
    %5 = vector.extract_strided_slice %0 {offsets = [4, 0], sizes = [1, 128], strides = [1, 1]} : vector<8x128xf32> to vector<1x128xf32>
    %6 = vector.extract_strided_slice %0 {offsets = [5, 0], sizes = [1, 128], strides = [1, 1]} : vector<8x128xf32> to vector<1x128xf32>
    %c0_1 = arith.constant 0 : index
    %c0_2 = arith.constant 0 : index
    %7 = vector.load %arg1[%c0_1, %c0_2] : memref<256x16xbf16, #tpu.memory_space<vmem>>, vector<256x16xbf16>
    %c0_3 = arith.constant 0 : index
    %c0_4 = arith.constant 0 : index
    %8 = vector.load %arg2[%c0_3, %c0_4] : memref<16x128xbf16, #tpu.memory_space<vmem>>, vector<16x128xbf16>
    %cst = arith.constant dense<0.000000e+00> : vector<256x128xf32>
    %9 = tpu.matmul %7, %8, %cst {dimension_numbers = #tpu.dot_dimension_numbers<[1], [0], [0], [1], [0, 0, 1, 1], [], []>} : vector<256x16xbf16>, vector<16x128xbf16>, vector<256x128xf32> -> vector<256x128xf32>
    %10 = vector.broadcast %1 : vector<1x128xf32> to vector<256x128xf32>
    %11 = arith.addf %9, %10 : vector<256x128xf32>
    %cst_5 = arith.constant 0.000000e+00 : f32
    %12 = vector.broadcast %cst_5 : f32 to vector<256x128xf32>
    %13 = arith.maximumf %11, %12 : vector<256x128xf32>
    %14 = arith.truncf %13 : vector<256x128xf32> to vector<256x128xbf16>
    %c0_6 = arith.constant 0 : index
    %c0_7 = arith.constant 0 : index
    %15 = vector.load %arg3[%c0_6, %c0_7] : memref<128x128xbf16, #tpu.memory_space<vmem>>, vector<128x128xbf16>
    %cst_8 = arith.constant dense<0.000000e+00> : vector<256x128xf32>
    %16 = tpu.matmul %14, %15, %cst_8 {dimension_numbers = #tpu.dot_dimension_numbers<[1], [0], [0], [1], [0, 0, 1, 1], [], []>} : vector<256x128xbf16>, vector<128x128xbf16>, vector<256x128xf32> -> vector<256x128xf32>
    %17 = vector.broadcast %2 : vector<1x128xf32> to vector<256x128xf32>
    %18 = arith.addf %16, %17 : vector<256x128xf32>
    %cst_9 = arith.constant 0.000000e+00 : f32
    %19 = vector.broadcast %cst_9 : f32 to vector<256x128xf32>
    %20 = arith.maximumf %18, %19 : vector<256x128xf32>
    %21 = arith.truncf %20 : vector<256x128xf32> to vector<256x128xbf16>
    %c0_10 = arith.constant 0 : index
    %c0_11 = arith.constant 0 : index
    %22 = vector.load %arg4[%c0_10, %c0_11] : memref<128x128xbf16, #tpu.memory_space<vmem>>, vector<128x128xbf16>
    %cst_12 = arith.constant dense<0.000000e+00> : vector<256x128xf32>
    %23 = tpu.matmul %21, %22, %cst_12 {dimension_numbers = #tpu.dot_dimension_numbers<[1], [0], [0], [1], [0, 0, 1, 1], [], []>} : vector<256x128xbf16>, vector<128x128xbf16>, vector<256x128xf32> -> vector<256x128xf32>
    %24 = vector.broadcast %3 : vector<1x128xf32> to vector<256x128xf32>
    %25 = arith.addf %23, %24 : vector<256x128xf32>
    %cst_13 = arith.constant 0.000000e+00 : f32
    %26 = vector.broadcast %cst_13 : f32 to vector<256x128xf32>
    %27 = arith.maximumf %25, %26 : vector<256x128xf32>
    %28 = arith.addf %13, %27 : vector<256x128xf32>
    %29 = arith.truncf %28 : vector<256x128xf32> to vector<256x128xbf16>
    %c0_14 = arith.constant 0 : index
    %c0_15 = arith.constant 0 : index
    %30 = vector.load %arg5[%c0_14, %c0_15] : memref<128x128xbf16, #tpu.memory_space<vmem>>, vector<128x128xbf16>
    %cst_16 = arith.constant dense<0.000000e+00> : vector<256x128xf32>
    %31 = tpu.matmul %29, %30, %cst_16 {dimension_numbers = #tpu.dot_dimension_numbers<[1], [0], [0], [1], [0, 0, 1, 1], [], []>} : vector<256x128xbf16>, vector<128x128xbf16>, vector<256x128xf32> -> vector<256x128xf32>
    %32 = vector.broadcast %4 : vector<1x128xf32> to vector<256x128xf32>
    %33 = arith.addf %31, %32 : vector<256x128xf32>
    %cst_17 = arith.constant 0.000000e+00 : f32
    %34 = vector.broadcast %cst_17 : f32 to vector<256x128xf32>
    %35 = arith.maximumf %33, %34 : vector<256x128xf32>
    %36 = arith.truncf %35 : vector<256x128xf32> to vector<256x128xbf16>
    %c0_18 = arith.constant 0 : index
    %c0_19 = arith.constant 0 : index
    %37 = vector.load %arg6[%c0_18, %c0_19] : memref<128x128xbf16, #tpu.memory_space<vmem>>, vector<128x128xbf16>
    %cst_20 = arith.constant dense<0.000000e+00> : vector<256x128xf32>
    %38 = tpu.matmul %36, %37, %cst_20 {dimension_numbers = #tpu.dot_dimension_numbers<[1], [0], [0], [1], [0, 0, 1, 1], [], []>} : vector<256x128xbf16>, vector<128x128xbf16>, vector<256x128xf32> -> vector<256x128xf32>
    %39 = vector.broadcast %5 : vector<1x128xf32> to vector<256x128xf32>
    %40 = arith.addf %38, %39 : vector<256x128xf32>
    %cst_21 = arith.constant 0.000000e+00 : f32
    %41 = vector.broadcast %cst_21 : f32 to vector<256x128xf32>
    %42 = arith.maximumf %40, %41 : vector<256x128xf32>
    %43 = arith.addf %28, %42 : vector<256x128xf32>
    %44 = arith.truncf %43 : vector<256x128xf32> to vector<256x128xbf16>
    %c0_22 = arith.constant 0 : index
    %c0_23 = arith.constant 0 : index
    %45 = vector.load %arg7[%c0_22, %c0_23] : memref<128x128xbf16, #tpu.memory_space<vmem>>, vector<128x128xbf16>
    %cst_24 = arith.constant dense<0.000000e+00> : vector<256x128xf32>
    %46 = tpu.matmul %44, %45, %cst_24 {dimension_numbers = #tpu.dot_dimension_numbers<[1], [0], [0], [1], [0, 0, 1, 1], [], []>} : vector<256x128xbf16>, vector<128x128xbf16>, vector<256x128xf32> -> vector<256x128xf32>
    %47 = vector.broadcast %6 : vector<1x128xf32> to vector<256x128xf32>
    %48 = arith.addf %46, %47 : vector<256x128xf32>
    %c0_25 = arith.constant 0 : index
    %c0_26 = arith.constant 0 : index
    %49 = vector.load %arg9[%c0_25, %c0_26] : memref<256x128xf32, #tpu.memory_space<vmem>>, vector<256x128xf32>
    tpu.vector_store %arg9[%c0_25, %c0_26], %48 {strides = array<i32>} : memref<256x128xf32, #tpu.memory_space<vmem>>, vector<256x128xf32>,
    return
  }
  func.func @transform_0(%arg0: i32) -> (i32, i32) {
    %c0_i32 = arith.constant 0 : i32
    %c0_i32_0 = arith.constant 0 : i32
    return %arg0, %c0_i32 : i32, i32
  }
  func.func @transform_1(%arg0: i32) -> (i32, i32) {
    %c0_i32 = arith.constant 0 : i32
    %c0_i32_0 = arith.constant 0 : i32
    %c0_i32_1 = arith.constant 0 : i32
    return %c0_i32, %c0_i32_0 : i32, i32
  }
  func.func @transform_2(%arg0: i32) -> (i32, i32) {
    %c0_i32 = arith.constant 0 : i32
    %c0_i32_0 = arith.constant 0 : i32
    %c0_i32_1 = arith.constant 0 : i32
    return %c0_i32, %c0_i32_0 : i32, i32
  }
  func.func @transform_3(%arg0: i32) -> (i32, i32) {
    %c0_i32 = arith.constant 0 : i32
    %c0_i32_0 = arith.constant 0 : i32
    %c0_i32_1 = arith.constant 0 : i32
    return %c0_i32, %c0_i32_0 : i32, i32
  }
  func.func @transform_4(%arg0: i32) -> (i32, i32) {
    %c0_i32 = arith.constant 0 : i32
    %c0_i32_0 = arith.constant 0 : i32
    %c0_i32_1 = arith.constant 0 : i32
    return %c0_i32, %c0_i32_0 : i32, i32
  }
  func.func @transform_5(%arg0: i32) -> (i32, i32) {
    %c0_i32 = arith.constant 0 : i32
    %c0_i32_0 = arith.constant 0 : i32
    %c0_i32_1 = arith.constant 0 : i32
    return %c0_i32, %c0_i32_0 : i32, i32
  }
  func.func @transform_6(%arg0: i32) -> (i32, i32) {
    %c0_i32 = arith.constant 0 : i32
    %c0_i32_0 = arith.constant 0 : i32
    %c0_i32_1 = arith.constant 0 : i32
    return %c0_i32, %c0_i32_0 : i32, i32
  }
  func.func @transform_7(%arg0: i32) -> (i32, i32) {
    %c0_i32 = arith.constant 0 : i32
    %c0_i32_0 = arith.constant 0 : i32
    %c0_i32_1 = arith.constant 0 : i32
    return %c0_i32, %c0_i32_0 : i32, i32
  }
  func.func @transform_8(%arg0: i32) -> (i32, i32) {
    %c0_i32 = arith.constant 0 : i32
    %c0_i32_0 = arith.constant 0 : i32
    return %arg0, %c0_i32 : i32, i32
  }
}

</mosaic_0001>

<bundles_post_ra>
// kernel: linear_model_forward.1
= control target key start
LH: loop header
LB: loop body
LE: loop exit
PB: predicated region body
PF: predicated region fallthrough
CT: control target
= control target key end

     0   :  { %13 = vsyncpa [#allocation3], 0  ;;  %s3409_s0 = inlined_call_operand.vmem [shape: bf16[256,16], index: 0, kind: input, shape index: {}]   ;;  %s3410_s1 = inlined_call_operand.hbm [shape: bf16[16,128], index: 1, kind: input, shape index: {}]   ;;  %s3411_s2 = inlined_call_operand.vmem [shape: bf16[128,128], index: 2, kind: input, shape index: {}]   ;;  %s3412_s3 = inlined_call_operand.vmem [shape: bf16[128,128], index: 3, kind: input, shape index: {}]   ;;  %s3413_s4 = inlined_call_operand.vmem [shape: bf16[128,128], index: 4, kind: input, shape index: {}]   ;;  %s3414_s5 = inlined_call_operand.hbm [shape: bf16[128,128], index: 5, kind: input, shape index: {}]   ;;  %s3415_s6 = inlined_call_operand.hbm [shape: bf16[128,128], index: 6, kind: input, shape index: {}]   ;;  %s3416_s7 = inlined_call_operand.vmem [shape: f32[8,128], index: 7, kind: input, shape index: {}]   ;;  %s3417_s8 = inlined_call_operand.vmem [shape: f32[256,128], index: 8, kind: output, shape index: {}]  }
   0x1   :  { %14 = vsyncpa [#allocation5], 0  ;;  %s2520_s27 = smov [#allocation4]   ;;  %s2521_s29 = smov [#allocation2]  }
   0x2   :  { %s40_s28 = sshll.u32 %s2520_s27, 4  ;;  %s22_s30 = sshll.u32 %s2521_s29, 4  ;;  %s41_s28 = int_to_ptr.vmem [resolvable:$true] %s40_s28  ;;  %s23_s30 = int_to_ptr.vmem [resolvable:$true] %s22_s30 }
   0x3   :  { %s2464_s9 = scalar_lea.vmem %s41_s28, 1024  ;;  %p2469_p1 = scmp.lt.s32.totalorder %s41_s28, %s41_s28 }
   0x4   :  { %p2465_p0 = scmp.ne.s32.totalorder %s41_s28, %s2464_s9  ;;  %p2470_p2 = scmp.lt.s32.totalorder %s2464_s9, %s2464_s9 }
   0x6   :  { %p2471_p3 = por %p2470_p2, %p2469_p1 }
   0x8   :  { %p2472_p4 = pnand %p2471_p3, %p2465_p0 }
   0xa   :  { %2475 = shalt.err (!%p2472_p4)
}
   0xb   :  { %s2522_s10 = smov 64   ;;  %s2523_s11 = smov 4  }
   0xc   :  { %46 = dma.hbm_to_vmem [thread:$0]  %s3414_s5, 1024, %s41_s28, [#allocation5], %s2522_s10, %s2522_s10, %s2523_s11  }
   0xd   :  { %s2484_s14 = scalar_lea.vmem %s23_s30, 128  ;;  %p2489_p6 = scmp.lt.s32.totalorder %s23_s30, %s23_s30 }
   0xe   :  { %p2485_p5 = scmp.ne.s32.totalorder %s23_s30, %s2484_s14  ;;  %p2490_p7 = scmp.lt.s32.totalorder %s2484_s14, %s2484_s14 }
  0x10   :  { %p2491_p8 = por %p2490_p7, %p2489_p6 }
  0x12   :  { %p2492_p9 = pnand %p2491_p8, %p2485_p5 }
  0x14   :  { %2495 = shalt.err (!%p2492_p9)
}
  0x15   :  { %28 = dma.hbm_to_vmem [thread:$0]  %s3410_s1, 128, %s23_s30, [#allocation3], %s2522_s10, %s2522_s10, %s2523_s11  }
  0x16   :  { %s2524_s17 = smov [#allocation6]  }
  0x17   :  { %s52_s18 = sshll.u32 %s2524_s17, 4  ;;  %s53_s18 = int_to_ptr.vmem [resolvable:$true] %s52_s18 }
  0x18   :  { %s2504_s19 = scalar_lea.vmem %s53_s18, 1024  ;;  %p2509_p11 = scmp.lt.s32.totalorder %s53_s18, %s53_s18 }
  0x19   :  { %p2505_p10 = scmp.ne.s32.totalorder %s53_s18, %s2504_s19  ;;  %p2510_p12 = scmp.lt.s32.totalorder %s2504_s19, %s2504_s19 }
  0x1b   :  { %p2511_p13 = por %p2510_p12, %p2509_p11 }
  0x1d   :  { %p2512_p0 = pnand %p2511_p13, %p2505_p10 }
  0x1f   :  { %2515 = shalt.err (!%p2512_p0)
}
  0x20   :  { %58 = dma.hbm_to_vmem [thread:$0]  %s3415_s6, 1024, %s53_s18, [#allocation5], %s2522_s10, %s2522_s10, %s2523_s11  }
  0x21   :  { %2516 = dma.done.wait [#allocation3], 128  }
  0x22   :  { %2517 = vsyncadd [#allocation3], 4294967168 }
  0x23   :  { %2518 = dma.done.wait [#allocation5], 2048  }
  0x24   :  { %2519 = vsyncadd [#allocation5], 4294965248  ;;  %v2398_v0 = vld [vmem:[#allocation2] sm:$0xff]   ;;  %vm196_vm0 = vcmask 130048   ;;  %v2400_v2 = vld [vmem:[%s3409_s0 + $0x8] sm:$0xff]   ;;  %v106_v32 = vlaneseq }
  0x25   :  { %v2399_v1 = vld [vmem:[%s3409_s0] sm:$0xff]   ;;  %2103 = vmatprep.subr.bf16.mxu0 %v2398_v0  ;;  %v2401_v3 = vld [vmem:[%s3409_s0 + $0x10] sm:$0xff]   ;;  %v2402_v4 = vld [vmem:[%s3409_s0 + $0x18] sm:$0xff]  }
  0x26   :  { %2104 = vmatpush3.bf16.msra.mxu0 %v2398_v0  ;;  %2105 = vmatprep.mubr.msk.bf16.mxu0 %vm196_vm0, %v2399_v1  ;;  %v2403_v5 = vld [vmem:[%s3409_s0 + $0x20] sm:$0xff]   ;;  %v2404_v6 = vld [vmem:[%s3409_s0 + $0x28] sm:$0xff]   ;;  %v2415_v7 = vld [vmem:[%s3411_s2 + $0x38] sm:$0xff]   ;;  %v2688_v33 = vshrl.u32 %v106_v32, 7 }
  0x27   :  { %v2416_v8 = vld [vmem:[%s3411_s2 + $0x30] sm:$0xff]   ;;  %2137 = vmatprep.subr.bf16.mxu1 %v2415_v7  ;;  %v2417_v10 = vld [vmem:[%s3411_s2 + $0x28] sm:$0xff]   ;;  %v2418_v11 = vld [vmem:[%s3411_s2 + $0x20] sm:$0xff]  }
  0x28   :  { %v2405_v9 = vld [vmem:[%s3409_s0 + $0x30] sm:$0xff]   ;;  %2138 = vmatpush3.bf16.msra.mxu1 %v2415_v7  ;;  %v2406_v12 = vld [vmem:[%s3409_s0 + $0x38] sm:$0xff]   ;;  %v2407_v13 = vld [vmem:[%s3409_s0 + $0x40] sm:$0xff]   ;;  %v108_v34 = vsub.s32 0, %v2688_v33 }
  0x29   :  { %2106 = vmatmul.mubr.msk.bf16.vlgmr.msra.gmra.mxu0 %vm196_vm0, %v2400_v2  ;;  %2139 = vmatprep.subr.bf16.mxu1 %v2416_v8  ;;  %v2419_v14 = vld [vmem:[%s3411_s2 + $0x18] sm:$0xff]   ;;  %v2408_v15 = vld [vmem:[%s3409_s0 + $0x48] sm:$0xff]   ;;  %v2409_v16 = vld [vmem:[%s3409_s0 + $0x50] sm:$0xff]  }
  0x2a   :  { %2109 = vmatprep.mubr.msk.bf16.mxu0 %vm196_vm0, %v2401_v3  ;;  %v2410_v17 = vld [vmem:[%s3409_s0 + $0x58] sm:$0xff]   ;;  %v2411_v18 = vld [vmem:[%s3409_s0 + $0x60] sm:$0xff]   ;;  %v2412_v19 = vld [vmem:[%s3409_s0 + $0x68] sm:$0xff]  }
  0x2b   :  { %v2413_v20 = vld [vmem:[%s3409_s0 + $0x70] sm:$0xff]   ;;  %v2414_v21 = vld [vmem:[%s3409_s0 + $0x78] sm:$0xff]   ;;  %v2421_v23 = vld [vmem:[%s3411_s2 + $0x8] sm:$0xff]  }
  0x2c   :  { %2140 = vmatpush3.bf16.msra.mxu1 %v2416_v8  ;;  %v2420_v22 = vld [vmem:[%s3411_s2 + $0x10] sm:$0xff]   ;;  %v2422_v24 = vld [vmem:[%s3411_s2] sm:$0xff]   ;;  %v2423_v25 = vld [vmem:[%s3412_s3 + $0x38] sm:$0xff]  }
  0x2d   :  { %2141 = vmatprep.subr.bf16.mxu1 %v2417_v10  ;;  %v2424_v26 = vld [vmem:[%s3412_s3 + $0x30] sm:$0xff]   ;;  %2185 = vmatprep.subr.bf16.mxu0 %v2423_v25  ;;  %v2425_v27 = vld [vmem:[%s3412_s3 + $0x28] sm:$0xff]   ;;  %v2426_v28 = vld [vmem:[%s3412_s3 + $0x20] sm:$0xff]  }
  0x2e   :  { %2186 = vmatpush3.bf16.msra.mxu0 %v2423_v25  ;;  %v2427_v29 = vld [vmem:[%s3412_s3 + $0x18] sm:$0xff]   ;;  %v2428_v30 = vld [vmem:[%s3412_s3 + $0x10] sm:$0xff]   ;;  %v2429_v31 = vld [vmem:[%s3412_s3 + $0x8] sm:$0xff]  }
  0x2f   :  { %2187 = vmatprep.subr.bf16.mxu0 %v2424_v26  ;;  %v2694_v35 = vld [vmem:[%s3416_s7] sm:$0xff] }
  0x30   :  { %2142 = vmatpush3.bf16.msra.mxu1 %v2417_v10  ;;  %v2697_v37 = vrot.slane %v2694_v35, %v108_v34 }
  0x31   :  { %2110 = vmatmul.mubr.msk.bf16.gmra.mxu0 %vm196_vm0, %v2402_v4  ;;  %2143 = vmatprep.subr.bf16.mxu1 %v2418_v11 }
  0x32   :  { %2113 = vmatprep.mubr.msk.bf16.mxu0 %vm196_vm0, %v2403_v5  ;;  %2188 = vmatpush3.bf16.msra.mxu0 %v2424_v26 }
  0x33   :  { %2189 = vmatprep.subr.bf16.mxu0 %v2425_v27 }
  0x34   :  { %2144 = vmatpush3.bf16.msra.mxu1 %v2418_v11 }
  0x35   :  { %2145 = vmatprep.subr.bf16.mxu1 %v2419_v14 }
  0x36   :  { %2190 = vmatpush3.bf16.msra.mxu0 %v2425_v27 }
  0x37   :  { %2191 = vmatprep.subr.bf16.mxu0 %v2426_v28 }
  0x38   :  { %2146 = vmatpush3.bf16.msra.mxu1 %v2419_v14 }
  0x39   :  { %2114 = vmatmul.mubr.msk.bf16.gmra.mxu0 %vm196_vm0, %v2404_v6  ;;  %2147 = vmatprep.subr.bf16.mxu1 %v2420_v22 }
  0x3a   :  { %2117 = vmatprep.mubr.msk.bf16.mxu0 %vm196_vm0, %v2405_v9  ;;  %2192 = vmatpush3.bf16.msra.mxu0 %v2426_v28 }
  0x3b   :  { %2193 = vmatprep.subr.bf16.mxu0 %v2427_v29 }
  0x3c   :  { %2148 = vmatpush3.bf16.msra.mxu1 %v2420_v22 }
  0x3d   :  { %2149 = vmatprep.subr.bf16.mxu1 %v2421_v23 }
  0x3e   :  { %2194 = vmatpush3.bf16.msra.mxu0 %v2427_v29 }
  0x3f   :  { %2195 = vmatprep.subr.bf16.mxu0 %v2428_v30 }
  0x40   :  { %2150 = vmatpush3.bf16.msra.mxu1 %v2421_v23 }
  0x41   :  { %2118 = vmatmul.mubr.msk.bf16.gmra.mxu0 %vm196_vm0, %v2406_v12  ;;  %2151 = vmatprep.subr.bf16.mxu1 %v2422_v24 }
  0x42   :  { %2121 = vmatprep.mubr.msk.bf16.mxu0 %vm196_vm0, %v2407_v13  ;;  %2196 = vmatpush3.bf16.msra.mxu0 %v2428_v30 }
  0x43   :  { %2197 = vmatprep.subr.bf16.mxu0 %v2429_v31 }
  0x44   :  { %2152 = vmatpush3.bf16.msra.mxu1 %v2422_v24 }
  0x46   :  { %2198 = vmatpush3.bf16.msra.mxu0 %v2429_v31 }
  0x49   :  { %2122 = vmatmul.mubr.msk.bf16.gmra.mxu0 %vm196_vm0, %v2408_v15 }
  0x4a   :  { %2125 = vmatprep.mubr.msk.bf16.mxu0 %vm196_vm0, %v2409_v16 }
  0x51   :  { %2126 = vmatmul.mubr.msk.bf16.gmra.mxu0 %vm196_vm0, %v2410_v17 }
  0x52   :  { %2129 = vmatprep.mubr.msk.bf16.mxu0 %vm196_vm0, %v2411_v18 }
  0x59   :  { %2130 = vmatmul.mubr.msk.bf16.gmra.mxu0 %vm196_vm0, %v2412_v19 }
  0x5a   :  { %2133 = vmatprep.mubr.msk.bf16.mxu0 %vm196_vm0, %v2413_v20 }
  0x61   :  { %2134 = vmatmul.mubr.msk.bf16.gmra.mxu0 %vm196_vm0, %v2414_v21 }
  0xe9   :  { %v2107_v36 = vpop.f32.mrf.mxu0 }
  0xea   :  { %v2706_v42 = vadd.f32 %v2107_v36, %v2697_v37 }
  0xeb   :  { %v279_v38 = vpop.f32.mrf.mxu0 }
  0xec   :  { %v2700_v40 = vadd.f32 %v279_v38, %v2697_v37  ;;  %v408_v49 = vmax.f32 %v2706_v42, 0.0 }
  0xed   :  { %v2108_v39 = vpop.f32.mrf.mxu0 }
  0xee   :  { %v2703_v41 = vadd.f32 %v2108_v39, %v2697_v37  ;;  %v406_v47 = vmax.f32 %v2700_v40, 0.0 }
  0xef   :  { %v282_v43 = vpop.f32.mrf.mxu0 }
  0xf0   :  { %v2709_v44 = vadd.f32 %v282_v43, %v2697_v37  ;;  %v409_v45 = vmax.f32 %v2703_v41, 0.0 }
  0xf1   :  { %v2111_v46 = vpop.f32.mrf.mxu0 }
  0xf2   :  { %v407_v48 = vmax.f32 %v2709_v44, 0.0  ;;  %v439_v52 = vpack.c.bf16 %v409_v45, %v408_v49  ;;  %v2730_v56 = vadd.f32 %v2111_v46, %v2697_v37 }
  0xf3   :  { %v295_v50 = vpop.f32.mrf.mxu0 }
  0xf4   :  { %v438_v51 = vpack.c.bf16 %v407_v48, %v406_v47  ;;  %v2724_v54 = vadd.f32 %v295_v50, %v2697_v37  ;;  %v412_v63 = vmax.f32 %v2730_v56, 0.0 }
  0xf5   :  { %v2112_v53 = vpop.f32.mrf.mxu0 }
  0xf6   :  { %v2727_v55 = vadd.f32 %v2112_v53, %v2697_v37  ;;  %2153 = vmatprep.mubr.bf16.mxu1 %v438_v51  ;;  %v410_v61 = vmax.f32 %v2724_v54, 0.0 }
  0xf7   :  { %v298_v57 = vpop.f32.mrf.mxu0  ;;  %2154 = vmatmul.mubr.bf16.vlgmr.msra.gmra.mxu1 %v439_v52 }
  0xf8   :  { %v2733_v58 = vadd.f32 %v298_v57, %v2697_v37  ;;  %v413_v59 = vmax.f32 %v2727_v55, 0.0 }
  0xf9   :  { %v2115_v60 = vpop.f32.mrf.mxu0 }
  0xfa   :  { %v411_v62 = vmax.f32 %v2733_v58, 0.0  ;;  %v441_v2 = vpack.c.bf16 %v413_v59, %v412_v63  ;;  %v2754_v6 = vadd.f32 %v2115_v60, %v2697_v37 }
  0xfb   :  { %v311_v0 = vpop.f32.mrf.mxu0 }
  0xfc   :  { %v440_v1 = vpack.c.bf16 %v411_v62, %v410_v61  ;;  %v2748_v4 = vadd.f32 %v311_v0, %v2697_v37  ;;  %v3438_v13 = vmax.f32 %v2754_v6, 0.0 }
  0xfd   :  { %v2116_v3 = vpop.f32.mrf.mxu0 }
  0xfe   :  { %v2751_v5 = vadd.f32 %v2116_v3, %v2697_v37  ;;  %2157 = vmatprep.mubr.bf16.mxu1 %v440_v1  ;;  %v3440_v11 = vmax.f32 %v2748_v4, 0.0 }
  0xff   :  { %v314_v7 = vpop.f32.mrf.mxu0  ;;  %2158 = vmatmul.mubr.bf16.gmra.mxu1 %v441_v2 }
 0x100   :  { %v2757_v8 = vadd.f32 %v314_v7, %v2697_v37  ;;  %v417_v9 = vmax.f32 %v2751_v5, 0.0 }
 0x101   :  { %v2119_v10 = vpop.f32.mrf.mxu0 }
 0x102   :  { %v3439_v12 = vmax.f32 %v2757_v8, 0.0  ;;  %v443_v16 = vpack.c.bf16 %v417_v9, %v3438_v13  ;;  %v2778_v20 = vadd.f32 %v2119_v10, %v2697_v37 }
 0x103   :  { %v327_v14 = vpop.f32.mrf.mxu0 }
 0x104   :  { %v442_v15 = vpack.c.bf16 %v3439_v12, %v3440_v11  ;;  %v2772_v18 = vadd.f32 %v327_v14, %v2697_v37  ;;  %v3434_v27 = vmax.f32 %v2778_v20, 0.0 }
 0x105   :  { %v2120_v17 = vpop.f32.mrf.mxu0 }
 0x106   :  { %v2775_v19 = vadd.f32 %v2120_v17, %v2697_v37  ;;  %2161 = vmatprep.mubr.bf16.mxu1 %v442_v15  ;;  %v3436_v25 = vmax.f32 %v2772_v18, 0.0 }
 0x107   :  { %v330_v21 = vpop.f32.mrf.mxu0  ;;  %2162 = vmatmul.mubr.bf16.gmra.mxu1 %v443_v16 }
 0x108   :  { %v2781_v22 = vadd.f32 %v330_v21, %v2697_v37  ;;  %v3437_v23 = vmax.f32 %v2775_v19, 0.0 }
 0x109   :  { %v2123_v24 = vpop.f32.mrf.mxu0 }
 0x10a   :  { %v3435_v26 = vmax.f32 %v2781_v22, 0.0  ;;  %v445_v30 = vpack.c.bf16 %v3437_v23, %v3434_v27  ;;  %v2802_v36 = vadd.f32 %v2123_v24, %v2697_v37 }
 0x10b   :  { %v343_v28 = vpop.f32.mrf.mxu0 }
 0x10c   :  { %v444_v29 = vpack.c.bf16 %v3435_v26, %v3436_v25  ;;  %v2796_v32 = vadd.f32 %v343_v28, %v2697_v37  ;;  %v3430_v52 = vmax.f32 %v2802_v36, 0.0 }
 0x10d   :  { %v2124_v31 = vpop.f32.mrf.mxu0 }
 0x10e   :  { %v2799_v34 = vadd.f32 %v2124_v31, %v2697_v37  ;;  %2165 = vmatprep.mubr.bf16.mxu1 %v444_v29  ;;  %v3432_v50 = vmax.f32 %v2796_v32, 0.0 }
 0x10f   :  { %v346_v38 = vpop.f32.mrf.mxu0  ;;  %2166 = vmatmul.mubr.bf16.gmra.mxu1 %v445_v30 }
 0x110   :  { %v2805_v39 = vadd.f32 %v346_v38, %v2697_v37  ;;  %v3433_v43 = vmax.f32 %v2799_v34, 0.0 }
 0x111   :  { %v2127_v46 = vpop.f32.mrf.mxu0 }
 0x112   :  { %v3431_v51 = vmax.f32 %v2805_v39, 0.0  ;;  %v447_v60 = vpack.c.bf16 %v3433_v43, %v3430_v52  ;;  %v2826_v3 = vadd.f32 %v2127_v46, %v2697_v37 }
 0x113   :  { %v359_v53 = vpop.f32.mrf.mxu0 }
 0x114   :  { %v446_v57 = vpack.c.bf16 %v3431_v51, %v3432_v50  ;;  %v2820_v1 = vadd.f32 %v359_v53, %v2697_v37  ;;  %v3418_v21 = vmax.f32 %v2826_v3, 0.0 }
 0x115   :  { %v2128_v0 = vpop.f32.mrf.mxu0 }
 0x116   :  { %v2823_v2 = vadd.f32 %v2128_v0, %v2697_v37  ;;  %2169 = vmatprep.mubr.bf16.mxu1 %v446_v57  ;;  %v3420_v16 = vmax.f32 %v2820_v1, 0.0 }
 0x117   :  { %v362_v7 = vpop.f32.mrf.mxu0  ;;  %2170 = vmatmul.mubr.bf16.gmra.mxu1 %v447_v60 }
 0x118   :  { %v2829_v10 = vadd.f32 %v362_v7, %v2697_v37  ;;  %v3421_v14 = vmax.f32 %v2823_v2, 0.0 }
 0x119   :  { %v2131_v15 = vpop.f32.mrf.mxu0 }
 0x11a   :  { %v3419_v17 = vmax.f32 %v2829_v10, 0.0  ;;  %v449_v29 = vpack.c.bf16 %v3421_v14, %v3418_v21  ;;  %v2850_v46 = vadd.f32 %v2131_v15, %v2697_v37 }
 0x11b   :  { %v375_v24 = vpop.f32.mrf.mxu0 }
 0x11c   :  { %v448_v28 = vpack.c.bf16 %v3419_v17, %v3420_v16  ;;  %v2844_v31 = vadd.f32 %v375_v24, %v2697_v37  ;;  %v3424_v21 = vmax.f32 %v2850_v46, 0.0 }
 0x11d   :  { %v2132_v30 = vpop.f32.mrf.mxu0 }
 0x11e   :  { %v2847_v38 = vadd.f32 %v2132_v30, %v2697_v37  ;;  %2173 = vmatprep.mubr.bf16.mxu1 %v448_v28  ;;  %v3423_v7 = vmax.f32 %v2844_v31, 0.0 }
 0x11f   :  { %v378_v53 = vpop.f32.mrf.mxu0  ;;  %2174 = vmatmul.mubr.bf16.gmra.mxu1 %v449_v29 }
 0x120   :  { %v2853_v57 = vadd.f32 %v378_v53, %v2697_v37  ;;  %v3425_v60 = vmax.f32 %v2847_v38, 0.0 }
 0x121   :  { %v2135_v0 = vpop.f32.mrf.mxu0 }
 0x122   :  { %v3422_v24 = vmax.f32 %v2853_v57, 0.0  ;;  %v451_v28 = vpack.c.bf16 %v3425_v60, %v3424_v21  ;;  %v2874_v16 = vadd.f32 %v2135_v0, %v2697_v37 }
 0x123   :  { %v391_v30 = vpop.f32.mrf.mxu0 }
 0x124   :  { %v450_v15 = vpack.c.bf16 %v3422_v24, %v3423_v7  ;;  %v2868_v53 = vadd.f32 %v391_v30, %v2697_v37  ;;  %v3426_v30 = vmax.f32 %v2874_v16, 0.0 }
 0x125   :  { %v2136_v29 = vpop.f32.mrf.mxu0 }
 0x126   :  { %v2871_v17 = vadd.f32 %v2136_v29, %v2697_v37  ;;  %2177 = vmatprep.mubr.bf16.mxu1 %v450_v15  ;;  %v3428_v21 = vmax.f32 %v2868_v53, 0.0  ;;  %v2433_v29 = vld [vmem:[%s3413_s4 + $0x28] sm:$0xff]  }
 0x127   :  { %v394_v14 = vpop.f32.mrf.mxu0  ;;  %2178 = vmatmul.mubr.bf16.gmra.mxu1 %v451_v28  ;;  %v2432_v28 = vld [vmem:[%s3413_s4 + $0x30] sm:$0xff]  }
 0x128   :  { %v2877_v24 = vadd.f32 %v394_v14, %v2697_v37  ;;  %v3429_v7 = vmax.f32 %v2871_v17, 0.0  ;;  %v2430_v37 = vld [vmem:[%s3412_s3] sm:$0xff]   ;;  %v2431_v14 = vld [vmem:[%s3413_s4 + $0x38] sm:$0xff]  }
 0x129   :  { %2199 = vmatprep.subr.bf16.mxu0 %v2430_v37  ;;  %2233 = vmatprep.subr.bf16.mxu1 %v2431_v14 }
 0x12a   :  { %v3427_v60 = vmax.f32 %v2877_v24, 0.0  ;;  %v453_v0 = vpack.c.bf16 %v3429_v7, %v3426_v30  ;;  %2200 = vmatpush3.bf16.msra.mxu0 %v2430_v37  ;;  %2234 = vmatpush3.bf16.msra.mxu1 %v2431_v14  ;;  %v2436_v37 = vld [vmem:[%s3413_s4 + $0x10] sm:$0xff]   ;;  %v2437_v14 = vld [vmem:[%s3413_s4 + $0x8] sm:$0xff]  }
 0x12b   :  { %2235 = vmatprep.subr.bf16.mxu1 %v2432_v28 }
 0x12c   :  { %v452_v15 = vpack.c.bf16 %v3427_v60, %v3428_v21 }
 0x12e   :  { %2181 = vmatprep.mubr.bf16.mxu1 %v452_v15  ;;  %2236 = vmatpush3.bf16.msra.mxu1 %v2432_v28  ;;  %v2434_v15 = vld [vmem:[%s3413_s4 + $0x20] sm:$0xff]   ;;  %v472_v28 = vsub.s32 1, %v2688_v33 }
 0x12f   :  { %2182 = vmatmul.mubr.bf16.gmra.mxu1 %v453_v0  ;;  %2237 = vmatprep.subr.bf16.mxu1 %v2433_v29  ;;  %v2435_v0 = vld [vmem:[%s3413_s4 + $0x18] sm:$0xff]  }
 0x130   :  { %v2917_v30 = vrot.slane %v2694_v35, %v472_v28 }
 0x132   :  { %2238 = vmatpush3.bf16.msra.mxu1 %v2433_v29 }
 0x133   :  { %2239 = vmatprep.subr.bf16.mxu1 %v2434_v15 }
 0x136   :  { %2240 = vmatpush3.bf16.msra.mxu1 %v2434_v15 }
 0x137   :  { %2241 = vmatprep.subr.bf16.mxu1 %v2435_v0 }
 0x13a   :  { %2242 = vmatpush3.bf16.msra.mxu1 %v2435_v0 }
 0x13b   :  { %2243 = vmatprep.subr.bf16.mxu1 %v2436_v37 }
 0x13e   :  { %2244 = vmatpush3.bf16.msra.mxu1 %v2436_v37 }
 0x13f   :  { %2245 = vmatprep.subr.bf16.mxu1 %v2437_v14 }
 0x142   :  { %2246 = vmatpush3.bf16.msra.mxu1 %v2437_v14 }
 0x1b7   :  { %v2155_v29 = vpop.f32.mrf.mxu1 }
 0x1b8   :  { %v565_v7 = vadd.f32 %v2155_v29, %v2917_v30 }
 0x1b9   :  { %v556_v15 = vpop.f32.mrf.mxu1 }
 0x1ba   :  { %v557_v21 = vadd.f32 %v556_v15, %v2917_v30  ;;  %v685_v27 = vmax.f32 %v565_v7, 0.0 }
 0x1bb   :  { %v2156_v60 = vpop.f32.mrf.mxu1 }
 0x1bc   :  { %v568_v0 = vadd.f32 %v2156_v60, %v2917_v30  ;;  %v683_v14 = vmax.f32 %v557_v21, 0.0 }
 0x1bd   :  { %v559_v52 = vpop.f32.mrf.mxu1 }
 0x1be   :  { %v560_v51 = vadd.f32 %v559_v52, %v2917_v30  ;;  %v686_v37 = vmax.f32 %v568_v0, 0.0 }
 0x1bf   :  { %v2159_v50 = vpop.f32.mrf.mxu1 }
 0x1c0   :  { %v684_v43 = vmax.f32 %v560_v51, 0.0  ;;  %v716_v28 = vpack.c.bf16 %v686_v37, %v685_v27  ;;  %v581_v60 = vadd.f32 %v2159_v50, %v2917_v30 }
 0x1c1   :  { %v572_v26 = vpop.f32.mrf.mxu1 }
 0x1c2   :  { %v715_v25 = vpack.c.bf16 %v684_v43, %v683_v14  ;;  %v573_v13 = vadd.f32 %v572_v26, %v2917_v30  ;;  %v689_v7 = vmax.f32 %v581_v60, 0.0 }
 0x1c3   :  { %v2160_v23 = vpop.f32.mrf.mxu1 }
 0x1c4   :  { %v584_v15 = vadd.f32 %v2160_v23, %v2917_v30  ;;  %2201 = vmatprep.mubr.bf16.mxu0 %v715_v25  ;;  %v687_v21 = vmax.f32 %v573_v13, 0.0 }
 0x1c5   :  { %v575_v29 = vpop.f32.mrf.mxu1  ;;  %2202 = vmatmul.mubr.bf16.vlgmr.msra.gmra.mxu0 %v716_v28 }
 0x1c6   :  { %v576_v52 = vadd.f32 %v575_v29, %v2917_v30  ;;  %v690_v0 = vmax.f32 %v584_v15, 0.0 }
 0x1c7   :  { %v2163_v12 = vpop.f32.mrf.mxu1 }
 0x1c8   :  { %v688_v51 = vmax.f32 %v576_v52, 0.0  ;;  %v718_v27 = vpack.c.bf16 %v690_v0, %v689_v7  ;;  %v597_v25 = vadd.f32 %v2163_v12, %v2917_v30 }
 0x1c9   :  { %v588_v11 = vpop.f32.mrf.mxu1 }
 0x1ca   :  { %v717_v43 = vpack.c.bf16 %v688_v51, %v687_v21  ;;  %v589_v26 = vadd.f32 %v588_v11, %v2917_v30  ;;  %v693_v60 = vmax.f32 %v597_v25, 0.0 }
 0x1cb   :  { %v2164_v37 = vpop.f32.mrf.mxu1 }
 0x1cc   :  { %v600_v23 = vadd.f32 %v2164_v37, %v2917_v30  ;;  %2205 = vmatprep.mubr.bf16.mxu0 %v717_v43  ;;  %v691_v13 = vmax.f32 %v589_v26, 0.0 }
 0x1cd   :  { %v591_v50 = vpop.f32.mrf.mxu1  ;;  %2206 = vmatmul.mubr.bf16.gmra.mxu0 %v718_v27 }
 0x1ce   :  { %v592_v14 = vadd.f32 %v591_v50, %v2917_v30  ;;  %v694_v28 = vmax.f32 %v600_v23, 0.0 }
 0x1cf   :  { %v2167_v15 = vpop.f32.mrf.mxu1 }
 0x1d0   :  { %v692_v29 = vmax.f32 %v592_v14, 0.0  ;;  %v720_v0 = vpack.c.bf16 %v694_v28, %v693_v60  ;;  %v613_v12 = vadd.f32 %v2167_v15, %v2917_v30 }
 0x1d1   :  { %v604_v52 = vpop.f32.mrf.mxu1 }
 0x1d2   :  { %v719_v21 = vpack.c.bf16 %v692_v29, %v691_v13  ;;  %v605_v11 = vadd.f32 %v604_v52, %v2917_v30  ;;  %v697_v25 = vmax.f32 %v613_v12, 0.0 }
 0x1d3   :  { %v2168_v51 = vpop.f32.mrf.mxu1 }
 0x1d4   :  { %v616_v7 = vadd.f32 %v2168_v51, %v2917_v30  ;;  %2209 = vmatprep.mubr.bf16.mxu0 %v719_v21  ;;  %v695_v26 = vmax.f32 %v605_v11, 0.0 }
 0x1d5   :  { %v607_v43 = vpop.f32.mrf.mxu1  ;;  %2210 = vmatmul.mubr.bf16.gmra.mxu0 %v720_v0 }
 0x1d6   :  { %v608_v27 = vadd.f32 %v607_v43, %v2917_v30  ;;  %v698_v37 = vmax.f32 %v616_v7, 0.0 }
 0x1d7   :  { %v2171_v23 = vpop.f32.mrf.mxu1 }
 0x1d8   :  { %v696_v50 = vmax.f32 %v608_v27, 0.0  ;;  %v722_v28 = vpack.c.bf16 %v698_v37, %v697_v25  ;;  %v629_v15 = vadd.f32 %v2171_v23, %v2917_v30 }
 0x1d9   :  { %v620_v14 = vpop.f32.mrf.mxu1 }
 0x1da   :  { %v721_v13 = vpack.c.bf16 %v696_v50, %v695_v26  ;;  %v621_v60 = vadd.f32 %v620_v14, %v2917_v30  ;;  %v701_v12 = vmax.f32 %v629_v15, 0.0 }
 0x1db   :  { %v2172_v29 = vpop.f32.mrf.mxu1 }
 0x1dc   :  { %v632_v52 = vadd.f32 %v2172_v29, %v2917_v30  ;;  %2213 = vmatprep.mubr.bf16.mxu0 %v721_v13  ;;  %v699_v11 = vmax.f32 %v621_v60, 0.0 }
 0x1dd   :  { %v623_v21 = vpop.f32.mrf.mxu1  ;;  %2214 = vmatmul.mubr.bf16.gmra.mxu0 %v722_v28 }
 0x1de   :  { %v624_v0 = vadd.f32 %v623_v21, %v2917_v30  ;;  %v702_v51 = vmax.f32 %v632_v52, 0.0 }
 0x1df   :  { %v2175_v7 = vpop.f32.mrf.mxu1 }
 0x1e0   :  { %v700_v43 = vmax.f32 %v624_v0, 0.0  ;;  %v724_v37 = vpack.c.bf16 %v702_v51, %v701_v12  ;;  %v645_v23 = vadd.f32 %v2175_v7, %v2917_v30 }
 0x1e1   :  { %v636_v27 = vpop.f32.mrf.mxu1 }
 0x1e2   :  { %v723_v26 = vpack.c.bf16 %v700_v43, %v699_v11  ;;  %v637_v25 = vadd.f32 %v636_v27, %v2917_v30  ;;  %v705_v15 = vmax.f32 %v645_v23, 0.0 }
 0x1e3   :  { %v2176_v50 = vpop.f32.mrf.mxu1 }
 0x1e4   :  { %v648_v14 = vadd.f32 %v2176_v50, %v2917_v30  ;;  %2217 = vmatprep.mubr.bf16.mxu0 %v723_v26  ;;  %v703_v60 = vmax.f32 %v637_v25, 0.0 }
 0x1e5   :  { %v639_v13 = vpop.f32.mrf.mxu1  ;;  %2218 = vmatmul.mubr.bf16.gmra.mxu0 %v724_v37 }
 0x1e6   :  { %v640_v28 = vadd.f32 %v639_v13, %v2917_v30  ;;  %v706_v29 = vmax.f32 %v648_v14, 0.0 }
 0x1e7   :  { %v2179_v52 = vpop.f32.mrf.mxu1 }
 0x1e8   :  { %v704_v21 = vmax.f32 %v640_v28, 0.0  ;;  %v726_v51 = vpack.c.bf16 %v706_v29, %v705_v15  ;;  %v661_v7 = vadd.f32 %v2179_v52, %v2917_v30 }
 0x1e9   :  { %v652_v0 = vpop.f32.mrf.mxu1 }
 0x1ea   :  { %v725_v11 = vpack.c.bf16 %v704_v21, %v703_v60  ;;  %v653_v12 = vadd.f32 %v652_v0, %v2917_v30  ;;  %v709_v23 = vmax.f32 %v661_v7, 0.0 }
 0x1eb   :  { %v2180_v43 = vpop.f32.mrf.mxu1 }
 0x1ec   :  { %v664_v27 = vadd.f32 %v2180_v43, %v2917_v30  ;;  %2221 = vmatprep.mubr.bf16.mxu0 %v725_v11  ;;  %v707_v25 = vmax.f32 %v653_v12, 0.0 }
 0x1ed   :  { %v655_v26 = vpop.f32.mrf.mxu1  ;;  %2222 = vmatmul.mubr.bf16.gmra.mxu0 %v726_v51 }
 0x1ee   :  { %v656_v37 = vadd.f32 %v655_v26, %v2917_v30  ;;  %v710_v50 = vmax.f32 %v664_v27, 0.0 }
 0x1ef   :  { %v2183_v14 = vpop.f32.mrf.mxu1 }
 0x1f0   :  { %v708_v13 = vmax.f32 %v656_v37, 0.0  ;;  %v728_v29 = vpack.c.bf16 %v710_v50, %v709_v23  ;;  %v677_v52 = vadd.f32 %v2183_v14, %v2917_v30  ;;  %v2438_v50 = vld [vmem:[%s3413_s4] sm:$0xff]   ;;  %v2440_v14 = vld [vmem:[#allocation4 + $0x30] sm:$0xff]  }
 0x1f1   :  { %v668_v28 = vpop.f32.mrf.mxu1  ;;  %2247 = vmatprep.subr.bf16.mxu1 %v2438_v50  ;;  %v2443_v23 = vld [vmem:[#allocation4 + $0x18] sm:$0xff]  }
 0x1f2   :  { %v727_v60 = vpack.c.bf16 %v708_v13, %v707_v25  ;;  %v669_v15 = vadd.f32 %v668_v28, %v2917_v30  ;;  %v713_v26 = vmax.f32 %v677_v52, 0.0  ;;  %2248 = vmatpush3.bf16.msra.mxu1 %v2438_v50  ;;  %v2439_v25 = vld [vmem:[#allocation4 + $0x38] sm:$0xff]   ;;  %v2442_v13 = vld [vmem:[#allocation4 + $0x20] sm:$0xff]   ;;  %v2444_v28 = vld [vmem:[#allocation4 + $0x10] sm:$0xff]  }
 0x1f3   :  { %v2184_v21 = vpop.f32.mrf.mxu1  ;;  %2281 = vmatprep.subr.bf16.mxu0 %v2439_v25 }
 0x1f4   :  { %v680_v0 = vadd.f32 %v2184_v21, %v2917_v30  ;;  %2225 = vmatprep.mubr.bf16.mxu0 %v727_v60  ;;  %v711_v27 = vmax.f32 %v669_v15, 0.0  ;;  %2282 = vmatpush3.bf16.msra.mxu0 %v2439_v25  ;;  %v2445_v60 = vld [vmem:[#allocation4 + $0x8] sm:$0xff]  }
 0x1f5   :  { %v671_v11 = vpop.f32.mrf.mxu1  ;;  %2226 = vmatmul.mubr.bf16.gmra.mxu0 %v728_v29  ;;  %2283 = vmatprep.subr.bf16.mxu0 %v2440_v14  ;;  %v749_v29 = vsub.s32 2, %v2688_v33 }
 0x1f6   :  { %v672_v51 = vadd.f32 %v671_v11, %v2917_v30  ;;  %v714_v43 = vmax.f32 %v680_v0, 0.0  ;;  %v2441_v30 = vld [vmem:[#allocation4 + $0x28] sm:$0xff]  }
 0x1f7   :  { %v2956_v21 = vrot.slane %v2694_v35, %v749_v29 }
 0x1f8   :  { %v712_v12 = vmax.f32 %v672_v51, 0.0  ;;  %v730_v37 = vpack.c.bf16 %v714_v43, %v713_v26  ;;  %2284 = vmatpush3.bf16.msra.mxu0 %v2440_v14 }
 0x1f9   :  { %2285 = vmatprep.subr.bf16.mxu0 %v2441_v30 }
 0x1fa   :  { %v729_v7 = vpack.c.bf16 %v712_v12, %v711_v27 }
 0x1fc   :  { %2229 = vmatprep.mubr.bf16.mxu0 %v729_v7  ;;  %2286 = vmatpush3.bf16.msra.mxu0 %v2441_v30 }
 0x1fd   :  { %2230 = vmatmul.mubr.bf16.gmra.mxu0 %v730_v37  ;;  %2287 = vmatprep.subr.bf16.mxu0 %v2442_v13 }
 0x200   :  { %2288 = vmatpush3.bf16.msra.mxu0 %v2442_v13 }
 0x201   :  { %2289 = vmatprep.subr.bf16.mxu0 %v2443_v23 }
 0x204   :  { %2290 = vmatpush3.bf16.msra.mxu0 %v2443_v23 }
 0x205   :  { %2291 = vmatprep.subr.bf16.mxu0 %v2444_v28 }
 0x208   :  { %2292 = vmatpush3.bf16.msra.mxu0 %v2444_v28 }
 0x209   :  { %2293 = vmatprep.subr.bf16.mxu0 %v2445_v60 }
 0x20c   :  { %2294 = vmatpush3.bf16.msra.mxu0 %v2445_v60 }
 0x285   :  { %v2203_v15 = vpop.f32.mrf.mxu0 }
 0x286   :  { %v842_v11 = vadd.f32 %v2203_v15, %v2956_v21 }
 0x287   :  { %v833_v0 = vpop.f32.mrf.mxu0 }
 0x288   :  { %v834_v52 = vadd.f32 %v833_v0, %v2956_v21  ;;  %v962_v37 = vmax.f32 %v842_v11, 0.0 }
 0x289   :  { %v2204_v51 = vpop.f32.mrf.mxu0 }
 0x28a   :  { %v845_v43 = vadd.f32 %v2204_v51, %v2956_v21  ;;  %v960_v12 = vmax.f32 %v834_v52, 0.0  ;;  %v2977_v60 = vadd.f32 %v962_v37, %v408_v49 }
 0x28b   :  { %v836_v27 = vpop.f32.mrf.mxu0 }
 0x28c   :  { %v963_v26 = vmax.f32 %v845_v43, 0.0  ;;  %v837_v7 = vadd.f32 %v836_v27, %v2956_v21  ;;  %v2968_v13 = vadd.f32 %v960_v12, %v406_v47 }
 0x28d   :  { %v2207_v50 = vpop.f32.mrf.mxu0 }
 0x28e   :  { %v961_v25 = vmax.f32 %v837_v7, 0.0  ;;  %v2964_v14 = vadd.f32 %v963_v26, %v409_v45  ;;  %v858_v29 = vadd.f32 %v2207_v50, %v2956_v21 }
 0x28f   :  { %v849_v30 = vpop.f32.mrf.mxu0 }
 0x290   :  { %v2972_v23 = vadd.f32 %v961_v25, %v407_v48  ;;  %v850_v28 = vadd.f32 %v849_v30, %v2956_v21  ;;  %v1025_v47 = vpack.c.bf16 %v2964_v14, %v2977_v60  ;;  %v966_v42 = vmax.f32 %v858_v29, 0.0 }
 0x291   :  { %v2208_v41 = vpop.f32.mrf.mxu0  ;;  %v3441_v29 = vmax.f32 %v2748_v4, 0.0 }
 0x292   :  { %v861_v45 = vadd.f32 %v2208_v41, %v2956_v21  ;;  %v1024_v40 = vpack.c.bf16 %v2972_v23, %v2968_v13  ;;  %v964_v48 = vmax.f32 %v850_v28, 0.0  ;;  %v3001_v26 = vadd.f32 %v966_v42, %v412_v63 }
 0x293   :  { %v852_v44 = vpop.f32.mrf.mxu0 }
 0x294   :  { %v967_v15 = vmax.f32 %v861_v45, 0.0  ;;  %v853_v0 = vadd.f32 %v852_v44, %v2956_v21  ;;  %2249 = vmatprep.mubr.bf16.mxu1 %v1024_v40  ;;  %v2992_v43 = vadd.f32 %v964_v48, %v410_v61  ;;  %v3442_v45 = vmax.f32 %v2757_v8, 0.0 }
 0x295   :  { %v2211_v49 = vpop.f32.mrf.mxu0  ;;  %2250 = vmatmul.mubr.bf16.vlgmr.msra.gmra.mxu1 %v1025_v47  ;;  %v3443_v44 = vmax.f32 %v2754_v6, 0.0 }
 0x296   :  { %v965_v52 = vmax.f32 %v853_v0, 0.0  ;;  %v2988_v11 = vadd.f32 %v967_v15, %v413_v59  ;;  %v874_v7 = vadd.f32 %v2211_v49, %v2956_v21 }
 0x297   :  { %v865_v51 = vpop.f32.mrf.mxu0 }
 0x298   :  { %v2996_v27 = vadd.f32 %v965_v52, %v411_v62  ;;  %v866_v12 = vadd.f32 %v865_v51, %v2956_v21  ;;  %v1027_v58 = vpack.c.bf16 %v2988_v11, %v3001_v26  ;;  %v970_v56 = vmax.f32 %v874_v7, 0.0 }
 0x299   :  { %v2212_v55 = vpop.f32.mrf.mxu0  ;;  %v3444_v7 = vmax.f32 %v2775_v19, 0.0 }
 0x29a   :  { %v877_v59 = vadd.f32 %v2212_v55, %v2956_v21  ;;  %v1026_v54 = vpack.c.bf16 %v2996_v27, %v2992_v43  ;;  %v968_v62 = vmax.f32 %v866_v12, 0.0  ;;  %v3025_v48 = vadd.f32 %v970_v56, %v3443_v44 }
 0x29b   :  { %v868_v61 = vpop.f32.mrf.mxu0 }
 0x29c   :  { %v971_v37 = vmax.f32 %v877_v59, 0.0  ;;  %v869_v50 = vadd.f32 %v868_v61, %v2956_v21  ;;  %2253 = vmatprep.mubr.bf16.mxu1 %v1026_v54  ;;  %v3016_v41 = vadd.f32 %v968_v62, %v3441_v29  ;;  %v3445_v54 = vmax.f32 %v2772_v18, 0.0 }
 0x29d   :  { %v2215_v63 = vpop.f32.mrf.mxu0  ;;  %2254 = vmatmul.mubr.bf16.gmra.mxu1 %v1027_v58  ;;  %v3446_v58 = vmax.f32 %v2781_v22, 0.0 }
 0x29e   :  { %v969_v25 = vmax.f32 %v869_v50, 0.0  ;;  %v3012_v30 = vadd.f32 %v971_v37, %v417_v9  ;;  %v890_v15 = vadd.f32 %v2215_v63, %v2956_v21  ;;  %v3447_v50 = vmax.f32 %v2778_v20, 0.0 }
 0x29f   :  { %v881_v28 = vpop.f32.mrf.mxu0 }
 0x2a0   :  { %v3020_v40 = vadd.f32 %v969_v25, %v3442_v45  ;;  %v882_v47 = vadd.f32 %v881_v28, %v2956_v21  ;;  %v1029_v8 = vpack.c.bf16 %v3012_v30, %v3025_v48  ;;  %v974_v6 = vmax.f32 %v890_v15, 0.0 }
 0x2a1   :  { %v2216_v5 = vpop.f32.mrf.mxu0 }
 0x2a2   :  { %v893_v9 = vadd.f32 %v2216_v5, %v2956_v21  ;;  %v1028_v4 = vpack.c.bf16 %v3020_v40, %v3016_v41  ;;  %v972_v42 = vmax.f32 %v882_v47, 0.0  ;;  %v3049_v56 = vadd.f32 %v974_v6, %v3447_v50 }
 0x2a3   :  { %v884_v0 = vpop.f32.mrf.mxu0  ;;  %v3448_v5 = vmax.f32 %v2799_v34, 0.0  ;;  %v3451_v6 = vmax.f32 %v2802_v36, 0.0 }
 0x2a4   :  { %v975_v49 = vmax.f32 %v893_v9, 0.0  ;;  %v885_v52 = vadd.f32 %v884_v0, %v2956_v21  ;;  %2257 = vmatprep.mubr.bf16.mxu1 %v1028_v4  ;;  %v3040_v61 = vadd.f32 %v972_v42, %v3445_v54  ;;  %v3449_v0 = vmax.f32 %v2796_v32, 0.0 }
 0x2a5   :  { %v2219_v51 = vpop.f32.mrf.mxu0  ;;  %2258 = vmatmul.mubr.bf16.gmra.mxu1 %v1029_v8  ;;  %v3450_v42 = vmax.f32 %v2805_v39, 0.0 }
 0x2a6   :  { %v973_v12 = vmax.f32 %v885_v52, 0.0  ;;  %v3036_v55 = vadd.f32 %v975_v49, %v3444_v7  ;;  %v906_v63 = vadd.f32 %v2219_v51, %v2956_v21 }
 0x2a7   :  { %v897_v59 = vpop.f32.mrf.mxu0 }
 0x2a8   :  { %v3044_v62 = vadd.f32 %v973_v12, %v3446_v58  ;;  %v898_v37 = vadd.f32 %v897_v59, %v2956_v21  ;;  %v1031_v22 = vpack.c.bf16 %v3036_v55, %v3049_v56  ;;  %v978_v20 = vmax.f32 %v906_v63, 0.0 }
 0x2a9   :  { %v2220_v19 = vpop.f32.mrf.mxu0 }
 0x2aa   :  { %v909_v25 = vadd.f32 %v2220_v19, %v2956_v21  ;;  %v1030_v18 = vpack.c.bf16 %v3044_v62, %v3040_v61  ;;  %v976_v29 = vmax.f32 %v898_v37, 0.0  ;;  %v3073_v51 = vadd.f32 %v978_v20, %v3451_v6 }
 0x2ab   :  { %v900_v28 = vpop.f32.mrf.mxu0  ;;  %v3452_v19 = vmax.f32 %v2823_v2, 0.0  ;;  %v3455_v20 = vmax.f32 %v2826_v3, 0.0 }
 0x2ac   :  { %v979_v45 = vmax.f32 %v909_v25, 0.0  ;;  %v901_v47 = vadd.f32 %v900_v28, %v2956_v21  ;;  %2261 = vmatprep.mubr.bf16.mxu1 %v1030_v18  ;;  %v3064_v8 = vadd.f32 %v976_v29, %v3449_v0  ;;  %v3453_v28 = vmax.f32 %v2820_v1, 0.0 }
 0x2ad   :  { %v2223_v44 = vpop.f32.mrf.mxu0  ;;  %2262 = vmatmul.mubr.bf16.gmra.mxu1 %v1031_v22  ;;  %v3454_v29 = vmax.f32 %v2829_v10, 0.0 }
 0x2ae   :  { %v977_v15 = vmax.f32 %v901_v47, 0.0  ;;  %v3060_v9 = vadd.f32 %v979_v45, %v3448_v5  ;;  %v922_v12 = vadd.f32 %v2223_v44, %v2956_v21 }
 0x2af   :  { %v913_v4 = vpop.f32.mrf.mxu0 }
 0x2b0   :  { %v3068_v49 = vadd.f32 %v977_v15, %v3450_v42  ;;  %v914_v52 = vadd.f32 %v913_v4, %v2956_v21  ;;  %v1033_v39 = vpack.c.bf16 %v3060_v9, %v3073_v51  ;;  %v982_v36 = vmax.f32 %v922_v12, 0.0 }
 0x2b1   :  { %v2224_v34 = vpop.f32.mrf.mxu0 }
 0x2b2   :  { %v925_v7 = vadd.f32 %v2224_v34, %v2956_v21  ;;  %v1032_v32 = vpack.c.bf16 %v3068_v49, %v3064_v8  ;;  %v980_v54 = vmax.f32 %v914_v52, 0.0  ;;  %v3097_v44 = vadd.f32 %v982_v36, %v3455_v20 }
 0x2b3   :  { %v916_v59 = vpop.f32.mrf.mxu0  ;;  %v3456_v34 = vmax.f32 %v2847_v38, 0.0  ;;  %v3459_v36 = vmax.f32 %v2850_v46, 0.0 }
 0x2b4   :  { %v983_v58 = vmax.f32 %v925_v7, 0.0  ;;  %v917_v37 = vadd.f32 %v916_v59, %v2956_v21  ;;  %2265 = vmatprep.mubr.bf16.mxu1 %v1032_v32  ;;  %v3088_v22 = vadd.f32 %v980_v54, %v3453_v28  ;;  %v3457_v59 = vmax.f32 %v2844_v31, 0.0 }
 0x2b5   :  { %v2227_v50 = vpop.f32.mrf.mxu0  ;;  %2266 = vmatmul.mubr.bf16.gmra.mxu1 %v1033_v39  ;;  %v3458_v54 = vmax.f32 %v2853_v57, 0.0 }
 0x2b6   :  { %v981_v63 = vmax.f32 %v917_v37, 0.0  ;;  %v3084_v25 = vadd.f32 %v983_v58, %v3452_v19  ;;  %v938_v15 = vadd.f32 %v2227_v50, %v2956_v21 }
 0x2b7   :  { %v929_v18 = vpop.f32.mrf.mxu0 }
 0x2b8   :  { %v3092_v45 = vadd.f32 %v981_v63, %v3454_v29  ;;  %v930_v47 = vadd.f32 %v929_v18, %v2956_v21  ;;  %v1035_v10 = vpack.c.bf16 %v3084_v25, %v3097_v44  ;;  %v986_v3 = vmax.f32 %v938_v15, 0.0 }
 0x2b9   :  { %v2228_v2 = vpop.f32.mrf.mxu0  ;;  %v3460_v15 = vmax.f32 %v2871_v17, 0.0 }
 0x2ba   :  { %v941_v5 = vadd.f32 %v2228_v2, %v2956_v21  ;;  %v1034_v1 = vpack.c.bf16 %v3092_v45, %v3088_v22  ;;  %v984_v0 = vmax.f32 %v930_v47, 0.0  ;;  %v3121_v50 = vadd.f32 %v986_v3, %v3459_v36  ;;  %v3150_v3 = vld [vmem:[#allocation6 + $0x20] sm:$0xff]  }
 0x2bb   :  { %v932_v4 = vpop.f32.mrf.mxu0 }
 0x2bc   :  { %v987_v42 = vmax.f32 %v941_v5, 0.0  ;;  %v933_v52 = vadd.f32 %v932_v4, %v2956_v21  ;;  %2269 = vmatprep.mubr.bf16.mxu1 %v1034_v1  ;;  %v3112_v39 = vadd.f32 %v984_v0, %v3457_v59  ;;  %v3461_v5 = vmax.f32 %v2868_v53, 0.0  ;;  %v2447_v53 = vld [vmem:[#allocation6 + $0x38] sm:$0xff]  }
 0x2bd   :  { %v2231_v6 = vpop.f32.mrf.mxu0  ;;  %2270 = vmatmul.mubr.bf16.gmra.mxu1 %v1035_v10  ;;  %v3462_v4 = vmax.f32 %v2877_v24, 0.0  ;;  %v3463_v0 = vmax.f32 %v2874_v16, 0.0  ;;  %2377 = vmatprep.subr.bf16.mxu1 %v2447_v53  ;;  %v2448_v24 = vld [vmem:[#allocation6 + $0x30] sm:$0xff]   ;;  %v2449_v16 = vld [vmem:[#allocation6 + $0x28] sm:$0xff]  }
 0x2be   :  { %v985_v12 = vmax.f32 %v933_v52, 0.0  ;;  %v3108_v7 = vadd.f32 %v987_v42, %v3456_v34  ;;  %v954_v63 = vadd.f32 %v2231_v6, %v2956_v21  ;;  %v2446_v52 = vld [vmem:[#allocation4] sm:$0xff]   ;;  %2385 = vmatpush3.bf16.msra.mxu1 %v2447_v53  ;;  %v3153_v6 = vld [vmem:[#allocation6 + $0x18] sm:$0xff]   ;;  %v1058_v34 = vsub.s32 3, %v2688_v33 }
 0x2bf   :  { %v945_v32 = vpop.f32.mrf.mxu0  ;;  %2295 = vmatprep.subr.bf16.mxu0 %v2446_v52  ;;  %2378 = vmatprep.subr.bf16.mxu1 %v2448_v24 }
 0x2c0   :  { %v3116_v58 = vadd.f32 %v985_v12, %v3458_v54  ;;  %v946_v37 = vadd.f32 %v945_v32, %v2956_v21  ;;  %v1037_v57 = vpack.c.bf16 %v3108_v7, %v3121_v50  ;;  %v990_v46 = vmax.f32 %v954_v63, 0.0  ;;  %2296 = vmatpush3.bf16.msra.mxu0 %v2446_v52  ;;  %v3157_v12 = vld [vmem:[#allocation6 + $0x10] sm:$0xff]  }
 0x2c1   :  { %v2232_v38 = vpop.f32.mrf.mxu0  ;;  %2329 = vmatprep.subr.bf16.mxu0 %v2447_v53  ;;  %v3164_v59 = vrot.slane %v2694_v35, %v1058_v34 }
 0x2c2   :  { %v957_v19 = vadd.f32 %v2232_v38, %v2956_v21  ;;  %v1036_v31 = vpack.c.bf16 %v3116_v58, %v3112_v39  ;;  %v988_v28 = vmax.f32 %v946_v37, 0.0  ;;  %v3144_v42 = vadd.f32 %v990_v46, %v3463_v0  ;;  %2386 = vmatpush3.bf16.msra.mxu1 %v2448_v24 }
 0x2c3   :  { %v948_v18 = vpop.f32.mrf.mxu0  ;;  %2379 = vmatprep.subr.bf16.mxu1 %v2449_v16 }
 0x2c4   :  { %v991_v29 = vmax.f32 %v957_v19, 0.0  ;;  %v949_v47 = vadd.f32 %v948_v18, %v2956_v21  ;;  %2273 = vmatprep.mubr.bf16.mxu1 %v1036_v31  ;;  %v3136_v1 = vadd.f32 %v988_v28, %v3461_v5 }
 0x2c5   :  { %2274 = vmatmul.mubr.bf16.gmra.mxu1 %v1037_v57 }
 0x2c6   :  { %v989_v20 = vmax.f32 %v949_v47, 0.0  ;;  %v3132_v2 = vadd.f32 %v991_v29, %v3460_v15  ;;  %2387 = vmatpush3.bf16.msra.mxu1 %v2449_v16 }
 0x2c7   :  { %2380 = vmatprep.subr.bf16.mxu1 %v3150_v3 }
 0x2c8   :  { %v3140_v10 = vadd.f32 %v989_v20, %v3462_v4  ;;  %v1039_v17 = vpack.c.bf16 %v3132_v2, %v3144_v42 }
 0x2ca   :  { %v1038_v21 = vpack.c.bf16 %v3140_v10, %v3136_v1  ;;  %2388 = vmatpush3.bf16.msra.mxu1 %v3150_v3 }
 0x2cb   :  { %2381 = vmatprep.subr.bf16.mxu1 %v3153_v6 }
 0x2cc   :  { %2277 = vmatprep.mubr.bf16.mxu1 %v1038_v21 }
 0x2cd   :  { %2278 = vmatmul.mubr.bf16.gmra.mxu1 %v1039_v17 }
 0x2ce   :  { %2389 = vmatpush3.bf16.msra.mxu1 %v3153_v6 }
 0x2cf   :  { %2382 = vmatprep.subr.bf16.mxu1 %v3157_v12 }
 0x2d2   :  { %2390 = vmatpush3.bf16.msra.mxu1 %v3157_v12 }
 0x355   :  { %v2251_v32 = vpop.f32.mrf.mxu1 }
 0x356   :  { %v1151_v38 = vadd.f32 %v2251_v32, %v3164_v59 }
 0x357   :  { %v1142_v54 = vpop.f32.mrf.mxu1 }
 0x358   :  { %v1143_v36 = vadd.f32 %v1142_v54, %v3164_v59  ;;  %v1271_v47 = vmax.f32 %v1151_v38, 0.0 }
 0x359   :  { %v2252_v37 = vpop.f32.mrf.mxu1 }
 0x35a   :  { %v1154_v63 = vadd.f32 %v2252_v37, %v3164_v59  ;;  %v1269_v28 = vmax.f32 %v1143_v36, 0.0 }
 0x35b   :  { %v1145_v19 = vpop.f32.mrf.mxu1 }
 0x35c   :  { %v1146_v31 = vadd.f32 %v1145_v19, %v3164_v59  ;;  %v1272_v18 = vmax.f32 %v1154_v63, 0.0 }
 0x35d   :  { %v2255_v57 = vpop.f32.mrf.mxu1 }
 0x35e   :  { %v1270_v29 = vmax.f32 %v1146_v31, 0.0  ;;  %v1302_v35 = vpack.c.bf16 %v1272_v18, %v1271_v47  ;;  %v1167_v0 = vadd.f32 %v2255_v57, %v3164_v59 }
 0x35f   :  { %v1158_v46 = vpop.f32.mrf.mxu1 }
 0x360   :  { %v1301_v20 = vpack.c.bf16 %v1270_v29, %v1269_v28  ;;  %v1159_v5 = vadd.f32 %v1158_v46, %v3164_v59  ;;  %v1275_v37 = vmax.f32 %v1167_v0, 0.0 }
 0x361   :  { %v2256_v15 = vpop.f32.mrf.mxu1 }
 0x362   :  { %v1170_v4 = vadd.f32 %v2256_v15, %v3164_v59  ;;  %2297 = vmatprep.mubr.bf16.mxu0 %v1301_v20  ;;  %v1273_v32 = vmax.f32 %v1159_v5, 0.0 }
 0x363   :  { %v1161_v21 = vpop.f32.mrf.mxu1  ;;  %2298 = vmatmul.mubr.bf16.vlgmr.msra.gmra.mxu0 %v1302_v35 }
 0x364   :  { %v1162_v17 = vadd.f32 %v1161_v21, %v3164_v59  ;;  %2330 = vmatpush3.bf16.msra.mxu0 %v2447_v53  ;;  %v1276_v52 = vmax.f32 %v1170_v4, 0.0 }
 0x365   :  { %v2259_v34 = vpop.f32.mrf.mxu1  ;;  %2331 = vmatprep.subr.bf16.mxu0 %v2448_v24 }
 0x366   :  { %v1274_v54 = vmax.f32 %v1162_v17, 0.0  ;;  %v1304_v38 = vpack.c.bf16 %v1276_v52, %v1275_v37  ;;  %v1183_v57 = vadd.f32 %v2259_v34, %v3164_v59 }
 0x367   :  { %v1174_v36 = vpop.f32.mrf.mxu1 }
 0x368   :  { %v1303_v63 = vpack.c.bf16 %v1274_v54, %v1273_v32  ;;  %2332 = vmatpush3.bf16.msra.mxu0 %v2448_v24  ;;  %v1175_v31 = vadd.f32 %v1174_v36, %v3164_v59  ;;  %v1279_v20 = vmax.f32 %v1183_v57, 0.0 }
 0x369   :  { %v2260_v19 = vpop.f32.mrf.mxu1  ;;  %2333 = vmatprep.subr.bf16.mxu0 %v2449_v16 }
 0x36a   :  { %v1186_v18 = vadd.f32 %v2260_v19, %v3164_v59  ;;  %2301 = vmatprep.mubr.bf16.mxu0 %v1303_v63  ;;  %v1277_v24 = vmax.f32 %v1175_v31, 0.0 }
 0x36b   :  { %v1177_v53 = vpop.f32.mrf.mxu1  ;;  %2302 = vmatmul.mubr.bf16.gmra.mxu0 %v1304_v38 }
 0x36c   :  { %v1178_v28 = vadd.f32 %v1177_v53, %v3164_v59  ;;  %2334 = vmatpush3.bf16.msra.mxu0 %v2449_v16  ;;  %v1280_v29 = vmax.f32 %v1186_v18, 0.0 }
 0x36d   :  { %v2263_v47 = vpop.f32.mrf.mxu1  ;;  %2335 = vmatprep.subr.bf16.mxu0 %v3150_v3 }
 0x36e   :  { %v1278_v46 = vmax.f32 %v1178_v28, 0.0  ;;  %v1306_v5 = vpack.c.bf16 %v1280_v29, %v1279_v20  ;;  %v1199_v16 = vadd.f32 %v2263_v47, %v3164_v59 }
 0x36f   :  { %v1190_v35 = vpop.f32.mrf.mxu1 }
 0x370   :  { %v1305_v15 = vpack.c.bf16 %v1278_v46, %v1277_v24  ;;  %2336 = vmatpush3.bf16.msra.mxu0 %v3150_v3  ;;  %v1191_v0 = vadd.f32 %v1190_v35, %v3164_v59  ;;  %v1283_v37 = vmax.f32 %v1199_v16, 0.0 }
 0x371   :  { %v2264_v4 = vpop.f32.mrf.mxu1  ;;  %2337 = vmatprep.subr.bf16.mxu0 %v3153_v6 }
 0x372   :  { %v1202_v21 = vadd.f32 %v2264_v4, %v3164_v59  ;;  %2305 = vmatprep.mubr.bf16.mxu0 %v1305_v15  ;;  %v1281_v3 = vmax.f32 %v1191_v0, 0.0 }
 0x373   :  { %v1193_v17 = vpop.f32.mrf.mxu1  ;;  %2306 = vmatmul.mubr.bf16.gmra.mxu0 %v1306_v5 }
 0x374   :  { %v1194_v52 = vadd.f32 %v1193_v17, %v3164_v59  ;;  %2338 = vmatpush3.bf16.msra.mxu0 %v3153_v6  ;;  %v1284_v34 = vmax.f32 %v1202_v21, 0.0 }
 0x375   :  { %v2267_v32 = vpop.f32.mrf.mxu1  ;;  %2339 = vmatprep.subr.bf16.mxu0 %v3157_v12 }
 0x376   :  { %v1282_v54 = vmax.f32 %v1194_v52, 0.0  ;;  %v1308_v38 = vpack.c.bf16 %v1284_v34, %v1283_v37  ;;  %v1215_v6 = vadd.f32 %v2267_v32, %v3164_v59 }
 0x377   :  { %v1206_v36 = vpop.f32.mrf.mxu1 }
 0x378   :  { %v1307_v63 = vpack.c.bf16 %v1282_v54, %v1281_v3  ;;  %2340 = vmatpush3.bf16.msra.mxu0 %v3157_v12  ;;  %v1207_v31 = vadd.f32 %v1206_v36, %v3164_v59  ;;  %v1287_v46 = vmax.f32 %v1215_v6, 0.0 }
 0x379   :  { %v2268_v19 = vpop.f32.mrf.mxu1 }
 0x37a   :  { %v1218_v18 = vadd.f32 %v2268_v19, %v3164_v59  ;;  %2309 = vmatprep.mubr.bf16.mxu0 %v1307_v63  ;;  %v1285_v47 = vmax.f32 %v1207_v31, 0.0 }
 0x37b   :  { %v1209_v57 = vpop.f32.mrf.mxu1  ;;  %2310 = vmatmul.mubr.bf16.gmra.mxu0 %v1308_v38 }
 0x37c   :  { %v1210_v53 = vadd.f32 %v1209_v57, %v3164_v59  ;;  %v1288_v28 = vmax.f32 %v1218_v18, 0.0 }
 0x37d   :  { %v2271_v29 = vpop.f32.mrf.mxu1 }
 0x37e   :  { %v1286_v24 = vmax.f32 %v1210_v53, 0.0  ;;  %v1310_v35 = vpack.c.bf16 %v1288_v28, %v1287_v46  ;;  %v1231_v0 = vadd.f32 %v2271_v29, %v3164_v59 }
 0x37f   :  { %v1222_v20 = vpop.f32.mrf.mxu1 }
 0x380   :  { %v1309_v12 = vpack.c.bf16 %v1286_v24, %v1285_v47  ;;  %v1223_v5 = vadd.f32 %v1222_v20, %v3164_v59  ;;  %v1291_v3 = vmax.f32 %v1231_v0, 0.0 }
 0x381   :  { %v2272_v15 = vpop.f32.mrf.mxu1 }
 0x382   :  { %v1234_v4 = vadd.f32 %v2272_v15, %v3164_v59  ;;  %2313 = vmatprep.mubr.bf16.mxu0 %v1309_v12  ;;  %v1289_v34 = vmax.f32 %v1223_v5, 0.0 }
 0x383   :  { %v1225_v21 = vpop.f32.mrf.mxu1  ;;  %2314 = vmatmul.mubr.bf16.gmra.mxu0 %v1310_v35 }
 0x384   :  { %v1226_v16 = vadd.f32 %v1225_v21, %v3164_v59  ;;  %v1292_v17 = vmax.f32 %v1234_v4, 0.0 }
 0x385   :  { %v2275_v52 = vpop.f32.mrf.mxu1 }
 0x386   :  { %v1290_v32 = vmax.f32 %v1226_v16, 0.0  ;;  %v1312_v36 = vpack.c.bf16 %v1292_v17, %v1291_v3  ;;  %v1247_v31 = vadd.f32 %v2275_v52, %v3164_v59  ;;  %v2453_v3 = vld [vmem:[#allocation6 + $0x8] sm:$0xff]  }
 0x387   :  { %v1238_v54 = vpop.f32.mrf.mxu1  ;;  %2383 = vmatprep.subr.bf16.mxu1 %v2453_v3  ;;  %2341 = vmatprep.subr.bf16.mxu0 %v2453_v3 }
 0x388   :  { %v1311_v37 = vpack.c.bf16 %v1290_v32, %v1289_v34  ;;  %v1239_v38 = vadd.f32 %v1238_v54, %v3164_v59  ;;  %v1295_v47 = vmax.f32 %v1247_v31, 0.0  ;;  %2391 = vmatpush3.bf16.msra.mxu1 %v2453_v3  ;;  %2342 = vmatpush3.bf16.msra.mxu0 %v2453_v3  ;;  %v2454_v54 = vld [vmem:[#allocation6] sm:$0xff]  }
 0x389   :  { %v2276_v63 = vpop.f32.mrf.mxu1  ;;  %2343 = vmatprep.subr.bf16.mxu0 %v2454_v54  ;;  %2384 = vmatprep.subr.bf16.mxu1 %v2454_v54 }
 0x38a   :  { %v1250_v19 = vadd.f32 %v2276_v63, %v3164_v59  ;;  %2317 = vmatprep.mubr.bf16.mxu0 %v1311_v37  ;;  %v1293_v28 = vmax.f32 %v1239_v38, 0.0  ;;  %v3208_v37 = vld [vmem:[%s3416_s7] sm:$0xff] }
 0x38b   :  { %v1241_v18 = vpop.f32.mrf.mxu1  ;;  %2318 = vmatmul.mubr.bf16.gmra.mxu0 %v1312_v36 }
 0x38c   :  { %v1242_v6 = vadd.f32 %v1241_v18, %v3164_v59  ;;  %v1296_v57 = vmax.f32 %v1250_v19, 0.0  ;;  %2344 = vmatpush3.bf16.msra.mxu0 %v2454_v54  ;;  %2392 = vmatpush3.bf16.msra.mxu1 %v2454_v54 }
 0x38d   :  { %v2279_v53 = vpop.f32.mrf.mxu1 }
 0x38e   :  { %v1294_v29 = vmax.f32 %v1242_v6, 0.0  ;;  %v1314_v20 = vpack.c.bf16 %v1296_v57, %v1295_v47  ;;  %v1263_v5 = vadd.f32 %v2279_v53, %v3164_v59 }
 0x38f   :  { %v1254_v24 = vpop.f32.mrf.mxu1 }
 0x390   :  { %v1313_v46 = vpack.c.bf16 %v1294_v29, %v1293_v28  ;;  %v1255_v35 = vadd.f32 %v1254_v24, %v3164_v59  ;;  %v1299_v52 = vmax.f32 %v1263_v5, 0.0 }
 0x391   :  { %v2280_v12 = vpop.f32.mrf.mxu1 }
 0x392   :  { %v1266_v15 = vadd.f32 %v2280_v12, %v3164_v59  ;;  %2321 = vmatprep.mubr.bf16.mxu0 %v1313_v46  ;;  %v1297_v16 = vmax.f32 %v1255_v35, 0.0 }
 0x393   :  { %v1257_v4 = vpop.f32.mrf.mxu1  ;;  %2322 = vmatmul.mubr.bf16.gmra.mxu0 %v1314_v20 }
 0x394   :  { %v1258_v0 = vadd.f32 %v1257_v4, %v3164_v59  ;;  %v1300_v21 = vmax.f32 %v1266_v15, 0.0  ;;  %v1335_v59 = vsub.s32 4, %v2688_v33 }
 0x396   :  { %v1298_v17 = vmax.f32 %v1258_v0, 0.0  ;;  %v1316_v32 = vpack.c.bf16 %v1300_v21, %v1299_v52  ;;  %v3211_v36 = vrot.slane %v3208_v37, %v1335_v59 }
 0x398   :  { %v1315_v34 = vpack.c.bf16 %v1298_v17, %v1297_v16 }
 0x39a   :  { %2325 = vmatprep.mubr.bf16.mxu0 %v1315_v34 }
 0x39b   :  { %2326 = vmatmul.mubr.bf16.gmra.mxu0 %v1316_v32 }
 0x423   :  { %v2299_v63 = vpop.f32.mrf.mxu0 }
 0x424   :  { %v1428_v31 = vadd.f32 %v2299_v63, %v3211_v36 }
 0x425   :  { %v1419_v38 = vpop.f32.mrf.mxu0 }
 0x426   :  { %v1420_v19 = vadd.f32 %v1419_v38, %v3211_v36  ;;  %v1548_v47 = vmax.f32 %v1428_v31, 0.0 }
 0x427   :  { %v2300_v18 = vpop.f32.mrf.mxu0 }
 0x428   :  { %v1431_v6 = vadd.f32 %v2300_v18, %v3211_v36  ;;  %v1546_v53 = vmax.f32 %v1420_v19, 0.0  ;;  %v1580_v4 = vadd.f32 %v1548_v47, %v2977_v60 }
 0x429   :  { %v1422_v57 = vpop.f32.mrf.mxu0 }
 0x42a   :  { %v1549_v28 = vmax.f32 %v1431_v6, 0.0  ;;  %v1423_v29 = vadd.f32 %v1422_v57, %v3211_v36  ;;  %v1578_v35 = vadd.f32 %v1546_v53, %v2968_v13 }
 0x42b   :  { %v2303_v24 = vpop.f32.mrf.mxu0 }
 0x42c   :  { %v1547_v46 = vmax.f32 %v1423_v29, 0.0  ;;  %v1581_v20 = vadd.f32 %v1549_v28, %v2964_v14  ;;  %v1444_v0 = vadd.f32 %v2303_v24, %v3211_v36 }
 0x42d   :  { %v1435_v12 = vpop.f32.mrf.mxu0 }
 0x42e   :  { %v1579_v15 = vadd.f32 %v1547_v46, %v2972_v23  ;;  %v1436_v5 = vadd.f32 %v1435_v12, %v3211_v36  ;;  %v1611_v52 = vpack.c.bf16 %v1581_v20, %v1580_v4  ;;  %v1552_v13 = vmax.f32 %v1444_v0, 0.0 }
 0x42f   :  { %v2304_v21 = vpop.f32.mrf.mxu0 }
 0x430   :  { %v1447_v16 = vadd.f32 %v2304_v21, %v3211_v36  ;;  %v1610_v17 = vpack.c.bf16 %v1579_v15, %v1578_v35  ;;  %v1550_v32 = vmax.f32 %v1436_v5, 0.0  ;;  %v1584_v31 = vadd.f32 %v1552_v13, %v3001_v26 }
 0x431   :  { %v1438_v34 = vpop.f32.mrf.mxu0 }
 0x432   :  { %v1553_v3 = vmax.f32 %v1447_v16, 0.0  ;;  %v1439_v14 = vadd.f32 %v1438_v34, %v3211_v36  ;;  %2345 = vmatprep.mubr.bf16.mxu0 %v1610_v17  ;;  %v1582_v63 = vadd.f32 %v1550_v32, %v2992_v43 }
 0x433   :  { %v2307_v54 = vpop.f32.mrf.mxu0  ;;  %2346 = vmatmul.mubr.bf16.vlgmr.msra.gmra.mxu0 %v1611_v52 }
 0x434   :  { %v1551_v23 = vmax.f32 %v1439_v14, 0.0  ;;  %v1585_v59 = vadd.f32 %v1553_v3, %v2988_v11  ;;  %v1460_v18 = vadd.f32 %v2307_v54, %v3211_v36 }
 0x435   :  { %v1451_v60 = vpop.f32.mrf.mxu0 }
 0x436   :  { %v1583_v38 = vadd.f32 %v1551_v23, %v2996_v27  ;;  %v1452_v19 = vadd.f32 %v1451_v60, %v3211_v36  ;;  %v1613_v28 = vpack.c.bf16 %v1585_v59, %v1584_v31  ;;  %v1556_v43 = vmax.f32 %v1460_v18, 0.0 }
 0x437   :  { %v2308_v6 = vpop.f32.mrf.mxu0 }
 0x438   :  { %v1463_v57 = vadd.f32 %v2308_v6, %v3211_v36  ;;  %v1612_v53 = vpack.c.bf16 %v1583_v38, %v1582_v63  ;;  %v1554_v47 = vmax.f32 %v1452_v19, 0.0  ;;  %v1588_v5 = vadd.f32 %v1556_v43, %v3025_v48 }
 0x439   :  { %v1454_v29 = vpop.f32.mrf.mxu0 }
 0x43a   :  { %v1557_v24 = vmax.f32 %v1463_v57, 0.0  ;;  %v1455_v11 = vadd.f32 %v1454_v29, %v3211_v36  ;;  %2349 = vmatprep.mubr.bf16.mxu1 %v1612_v53  ;;  %v1586_v12 = vadd.f32 %v1554_v47, %v3016_v41 }
 0x43b   :  { %v2311_v46 = vpop.f32.mrf.mxu0  ;;  %2350 = vmatmul.mubr.bf16.vlgmr.msra.gmra.mxu1 %v1613_v28 }
 0x43c   :  { %v1555_v27 = vmax.f32 %v1455_v11, 0.0  ;;  %v1589_v20 = vadd.f32 %v1557_v24, %v3012_v30  ;;  %v1476_v4 = vadd.f32 %v2311_v46, %v3211_v36 }
 0x43d   :  { %v1467_v26 = vpop.f32.mrf.mxu0 }
 0x43e   :  { %v1587_v35 = vadd.f32 %v1555_v27, %v3020_v40  ;;  %v1468_v15 = vadd.f32 %v1467_v26, %v3211_v36  ;;  %v1615_v52 = vpack.c.bf16 %v1589_v20, %v1588_v5  ;;  %v1560_v41 = vmax.f32 %v1476_v4, 0.0 }
 0x43f   :  { %v2312_v0 = vpop.f32.mrf.mxu0 }
 0x440   :  { %v1479_v21 = vadd.f32 %v2312_v0, %v3211_v36  ;;  %v1614_v16 = vpack.c.bf16 %v1587_v35, %v1586_v12  ;;  %v1558_v34 = vmax.f32 %v1468_v15, 0.0  ;;  %v1592_v59 = vadd.f32 %v1560_v41, %v3049_v56 }
 0x441   :  { %v1470_v17 = vpop.f32.mrf.mxu0 }
 0x442   :  { %v1561_v32 = vmax.f32 %v1479_v21, 0.0  ;;  %v1471_v30 = vadd.f32 %v1470_v17, %v3211_v36  ;;  %2353 = vmatprep.mubr.bf16.mxu1 %v1614_v16  ;;  %v1590_v13 = vadd.f32 %v1558_v34, %v3040_v61 }
 0x443   :  { %v2315_v3 = vpop.f32.mrf.mxu0  ;;  %2354 = vmatmul.mubr.bf16.gmra.mxu1 %v1615_v52 }
 0x444   :  { %v1559_v40 = vmax.f32 %v1471_v30, 0.0  ;;  %v1593_v14 = vadd.f32 %v1561_v32, %v3036_v55  ;;  %v1492_v60 = vadd.f32 %v2315_v3, %v3211_v36 }
 0x445   :  { %v1483_v48 = vpop.f32.mrf.mxu0 }
 0x446   :  { %v1591_v54 = vadd.f32 %v1559_v40, %v3044_v62  ;;  %v1484_v23 = vadd.f32 %v1483_v48, %v3211_v36  ;;  %v1617_v18 = vpack.c.bf16 %v1593_v14, %v1592_v59  ;;  %v1564_v61 = vmax.f32 %v1492_v60, 0.0 }
 0x447   :  { %v2316_v63 = vpop.f32.mrf.mxu0 }
 0x448   :  { %v1495_v38 = vadd.f32 %v2316_v63, %v3211_v36  ;;  %v1616_v19 = vpack.c.bf16 %v1591_v54, %v1590_v13  ;;  %v1562_v6 = vmax.f32 %v1484_v23, 0.0  ;;  %v1596_v11 = vadd.f32 %v1564_v61, %v3073_v51 }
 0x449   :  { %v1486_v31 = vpop.f32.mrf.mxu0 }
 0x44a   :  { %v1565_v57 = vmax.f32 %v1495_v38, 0.0  ;;  %v1487_v55 = vadd.f32 %v1486_v31, %v3211_v36  ;;  %2357 = vmatprep.mubr.bf16.mxu1 %v1616_v19  ;;  %v1594_v29 = vadd.f32 %v1562_v6, %v3064_v8 }
 0x44b   :  { %v2319_v53 = vpop.f32.mrf.mxu0  ;;  %2358 = vmatmul.mubr.bf16.gmra.mxu1 %v1617_v18 }
 0x44c   :  { %v1563_v62 = vmax.f32 %v1487_v55, 0.0  ;;  %v1597_v28 = vadd.f32 %v1565_v57, %v3060_v9  ;;  %v1508_v43 = vadd.f32 %v2319_v53, %v3211_v36 }
 0x44d   :  { %v1499_v56 = vpop.f32.mrf.mxu0 }
 0x44e   :  { %v1595_v47 = vadd.f32 %v1563_v62, %v3068_v49  ;;  %v1500_v24 = vadd.f32 %v1499_v56, %v3211_v36  ;;  %v1619_v12 = vpack.c.bf16 %v1597_v28, %v1596_v11  ;;  %v1568_v8 = vmax.f32 %v1508_v43, 0.0 }
 0x44f   :  { %v2320_v46 = vpop.f32.mrf.mxu0 }
 0x450   :  { %v1511_v27 = vadd.f32 %v2320_v46, %v3211_v36  ;;  %v1618_v20 = vpack.c.bf16 %v1595_v47, %v1594_v29  ;;  %v1566_v35 = vmax.f32 %v1500_v24, 0.0  ;;  %v1600_v17 = vadd.f32 %v1568_v8, %v3097_v44 }
 0x451   :  { %v1502_v26 = vpop.f32.mrf.mxu0  ;;  %v1644_v29 = vsub.s32 5, %v2688_v33 }
 0x452   :  { %v1569_v15 = vmax.f32 %v1511_v27, 0.0  ;;  %v1503_v9 = vadd.f32 %v1502_v26, %v3211_v36  ;;  %2361 = vmatprep.mubr.bf16.mxu1 %v1618_v20  ;;  %v1598_v0 = vadd.f32 %v1566_v35, %v3088_v22 }
 0x453   :  { %v2323_v5 = vpop.f32.mrf.mxu0  ;;  %2362 = vmatmul.mubr.bf16.gmra.mxu1 %v1619_v12 }
 0x454   :  { %v1567_v49 = vmax.f32 %v1503_v9, 0.0  ;;  %v1601_v4 = vadd.f32 %v1569_v15, %v3084_v25  ;;  %v1524_v52 = vadd.f32 %v2323_v5, %v3211_v36 }
 0x455   :  { %v1515_v51 = vpop.f32.mrf.mxu0 }
 0x456   :  { %v1599_v21 = vadd.f32 %v1567_v49, %v3092_v45  ;;  %v1516_v16 = vadd.f32 %v1515_v51, %v3211_v36  ;;  %v1621_v3 = vpack.c.bf16 %v1601_v4, %v1600_v17  ;;  %v1572_v22 = vmax.f32 %v1524_v52, 0.0 }
 0x457   :  { %v2324_v34 = vpop.f32.mrf.mxu0 }
 0x458   :  { %v1527_v32 = vadd.f32 %v2324_v34, %v3211_v36  ;;  %v1620_v30 = vpack.c.bf16 %v1599_v21, %v1598_v0  ;;  %v1570_v40 = vmax.f32 %v1516_v16, 0.0  ;;  %v1604_v60 = vadd.f32 %v1572_v22, %v3121_v50 }
 0x459   :  { %v1518_v41 = vpop.f32.mrf.mxu0 }
 0x45a   :  { %v1573_v14 = vmax.f32 %v1527_v32, 0.0  ;;  %v1519_v25 = vadd.f32 %v1518_v41, %v3211_v36  ;;  %2365 = vmatprep.mubr.bf16.mxu1 %v1620_v30  ;;  %v1602_v54 = vadd.f32 %v1570_v40, %v3112_v39 }
 0x45b   :  { %v2327_v48 = vpop.f32.mrf.mxu0  ;;  %2366 = vmatmul.mubr.bf16.gmra.mxu1 %v1621_v3 }
 0x45c   :  { %v1571_v45 = vmax.f32 %v1519_v25, 0.0  ;;  %v1605_v13 = vadd.f32 %v1573_v14, %v3108_v7  ;;  %v1540_v63 = vadd.f32 %v2327_v48, %v3211_v36 }
 0x45d   :  { %v1531_v44 = vpop.f32.mrf.mxu0 }
 0x45e   :  { %v1603_v23 = vadd.f32 %v1571_v45, %v3116_v58  ;;  %v1532_v59 = vadd.f32 %v1531_v44, %v3211_v36  ;;  %v1623_v6 = vpack.c.bf16 %v1605_v13, %v1604_v60  ;;  %v1576_v39 = vmax.f32 %v1540_v63, 0.0 }
 0x45f   :  { %v2328_v38 = vpop.f32.mrf.mxu0 }
 0x460   :  { %v1543_v19 = vadd.f32 %v2328_v38, %v3211_v36  ;;  %v1622_v31 = vpack.c.bf16 %v1603_v23, %v1602_v54  ;;  %v1574_v57 = vmax.f32 %v1532_v59, 0.0  ;;  %v1608_v62 = vadd.f32 %v1576_v39, %v3144_v42 }
 0x461   :  { %v1534_v18 = vpop.f32.mrf.mxu0 }
 0x462   :  { %v1577_v55 = vmax.f32 %v1543_v19, 0.0  ;;  %v1535_v7 = vadd.f32 %v1534_v18, %v3211_v36  ;;  %2369 = vmatprep.mubr.bf16.mxu1 %v1622_v31  ;;  %v1606_v50 = vadd.f32 %v1574_v57, %v3136_v1  ;;  %v3279_v36 = vrot.slane %v3208_v37, %v1644_v29 }
 0x463   :  { %2370 = vmatmul.mubr.bf16.gmra.mxu1 %v1623_v6 }
 0x464   :  { %v1575_v58 = vmax.f32 %v1535_v7, 0.0  ;;  %v1609_v61 = vadd.f32 %v1577_v55, %v3132_v2 }
 0x466   :  { %v1607_v53 = vadd.f32 %v1575_v58, %v3140_v10  ;;  %v1625_v56 = vpack.c.bf16 %v1609_v61, %v1608_v62 }
 0x468   :  { %v1624_v28 = vpack.c.bf16 %v1607_v53, %v1606_v50 }
 0x46a   :  { %2373 = vmatprep.mubr.bf16.mxu1 %v1624_v28 }
 0x46b   :  { %2374 = vmatmul.mubr.bf16.gmra.mxu1 %v1625_v56 }
 0x4f3   :  { %v2347_v47 = vpop.f32.mrf.mxu0 }
 0x4f4   :  { %v1737_v24 = vadd.f32 %v2347_v47, %v3279_v36 }
 0x4f5   :  { %v1728_v11 = vpop.f32.mrf.mxu0 }
 0x4f6   :  { %1857 = vst [vmem:[%s3417_s8 + $0x10] sm:$0xff] %v1737_v24  ;;  %v1729_v2 = vadd.f32 %v1728_v11, %v3279_v36 }
 0x4f7   :  { %v2348_v1 = vpop.f32.mrf.mxu0 }
 0x4f8   :  { %1855 = vst [vmem:[%s3417_s8] sm:$0xff] %v1729_v2  ;;  %v1740_v33 = vadd.f32 %v2348_v1, %v3279_v36 }
 0x4f9   :  { %v1731_v10 = vpop.f32.mrf.mxu0 }
 0x4fa   :  { %1858 = vst [vmem:[%s3417_s8 + $0x18] sm:$0xff] %v1740_v33  ;;  %v1732_v42 = vadd.f32 %v1731_v10, %v3279_v36 }
 0x4fb   :  { %v2351_v37 = vpop.f32.mrf.mxu1 }
 0x4fc   :  { %1856 = vst [vmem:[%s3417_s8 + $0x8] sm:$0xff] %v1732_v42  ;;  %v1753_v43 = vadd.f32 %v2351_v37, %v3279_v36 }
 0x4fd   :  { %v1744_v46 = vpop.f32.mrf.mxu1 }
 0x4fe   :  { %1861 = vst [vmem:[%s3417_s8 + $0x30] sm:$0xff] %v1753_v43  ;;  %v1745_v27 = vadd.f32 %v1744_v46, %v3279_v36 }
 0x4ff   :  { %v2352_v20 = vpop.f32.mrf.mxu1 }
 0x500   :  { %1859 = vst [vmem:[%s3417_s8 + $0x20] sm:$0xff] %v1745_v27  ;;  %v1756_v26 = vadd.f32 %v2352_v20, %v3279_v36 }
 0x501   :  { %v1747_v12 = vpop.f32.mrf.mxu1 }
 0x502   :  { %1862 = vst [vmem:[%s3417_s8 + $0x38] sm:$0xff] %v1756_v26  ;;  %v1748_v35 = vadd.f32 %v1747_v12, %v3279_v36 }
 0x503   :  { %v2355_v15 = vpop.f32.mrf.mxu1 }
 0x504   :  { %1860 = vst [vmem:[%s3417_s8 + $0x28] sm:$0xff] %v1748_v35  ;;  %v1769_v9 = vadd.f32 %v2355_v15, %v3279_v36 }
 0x505   :  { %v1760_v8 = vpop.f32.mrf.mxu1 }
 0x506   :  { %1865 = vst [vmem:[%s3417_s8 + $0x50] sm:$0xff] %v1769_v9  ;;  %v1761_v5 = vadd.f32 %v1760_v8, %v3279_v36 }
 0x507   :  { %v2356_v49 = vpop.f32.mrf.mxu1 }
 0x508   :  { %1863 = vst [vmem:[%s3417_s8 + $0x40] sm:$0xff] %v1761_v5  ;;  %v1772_v4 = vadd.f32 %v2356_v49, %v3279_v36 }
 0x509   :  { %v1763_v51 = vpop.f32.mrf.mxu1 }
 0x50a   :  { %1866 = vst [vmem:[%s3417_s8 + $0x58] sm:$0xff] %v1772_v4  ;;  %v1764_v0 = vadd.f32 %v1763_v51, %v3279_v36 }
 0x50b   :  { %v2359_v21 = vpop.f32.mrf.mxu1 }
 0x50c   :  { %1864 = vst [vmem:[%s3417_s8 + $0x48] sm:$0xff] %v1764_v0  ;;  %v1785_v16 = vadd.f32 %v2359_v21, %v3279_v36 }
 0x50d   :  { %v1776_v17 = vpop.f32.mrf.mxu1 }
 0x50e   :  { %1869 = vst [vmem:[%s3417_s8 + $0x70] sm:$0xff] %v1785_v16  ;;  %v1777_v52 = vadd.f32 %v1776_v17, %v3279_v36 }
 0x50f   :  { %v2360_v34 = vpop.f32.mrf.mxu1 }
 0x510   :  { %1867 = vst [vmem:[%s3417_s8 + $0x60] sm:$0xff] %v1777_v52  ;;  %v1788_v32 = vadd.f32 %v2360_v34, %v3279_v36 }
 0x511   :  { %v1779_v30 = vpop.f32.mrf.mxu1 }
 0x512   :  { %1870 = vst [vmem:[%s3417_s8 + $0x78] sm:$0xff] %v1788_v32  ;;  %v1780_v41 = vadd.f32 %v1779_v30, %v3279_v36 }
 0x513   :  { %v2363_v3 = vpop.f32.mrf.mxu1 }
 0x514   :  { %1868 = vst [vmem:[%s3417_s8 + $0x68] sm:$0xff] %v1780_v41  ;;  %v1801_v40 = vadd.f32 %v2363_v3, %v3279_v36 }
 0x515   :  { %v1792_v14 = vpop.f32.mrf.mxu1 }
 0x516   :  { %1873 = vst [vmem:[%s3417_s8 + $0x90] sm:$0xff] %v1801_v40  ;;  %v1793_v25 = vadd.f32 %v1792_v14, %v3279_v36 }
 0x517   :  { %v2364_v22 = vpop.f32.mrf.mxu1 }
 0x518   :  { %1871 = vst [vmem:[%s3417_s8 + $0x80] sm:$0xff] %v1793_v25  ;;  %v1804_v48 = vadd.f32 %v2364_v22, %v3279_v36 }
 0x519   :  { %v1795_v45 = vpop.f32.mrf.mxu1 }
 0x51a   :  { %1874 = vst [vmem:[%s3417_s8 + $0x98] sm:$0xff] %v1804_v48  ;;  %v1796_v13 = vadd.f32 %v1795_v45, %v3279_v36 }
 0x51b   :  { %v2367_v44 = vpop.f32.mrf.mxu1 }
 0x51c   :  { %1872 = vst [vmem:[%s3417_s8 + $0x88] sm:$0xff] %v1796_v13  ;;  %v1817_v54 = vadd.f32 %v2367_v44, %v3279_v36 }
 0x51d   :  { %v1808_v23 = vpop.f32.mrf.mxu1 }
 0x51e   :  { %1877 = vst [vmem:[%s3417_s8 + $0xb0] sm:$0xff] %v1817_v54  ;;  %v1809_v59 = vadd.f32 %v1808_v23, %v3279_v36 }
 0x51f   :  { %v2368_v60 = vpop.f32.mrf.mxu1 }
 0x520   :  { %1875 = vst [vmem:[%s3417_s8 + $0xa0] sm:$0xff] %v1809_v59  ;;  %v1820_v63 = vadd.f32 %v2368_v60, %v3279_v36 }
 0x521   :  { %v1811_v38 = vpop.f32.mrf.mxu1 }
 0x522   :  { %1878 = vst [vmem:[%s3417_s8 + $0xb8] sm:$0xff] %v1820_v63  ;;  %v1812_v19 = vadd.f32 %v1811_v38, %v3279_v36 }
 0x523   :  { %v2371_v31 = vpop.f32.mrf.mxu1 }
 0x524   :  { %1876 = vst [vmem:[%s3417_s8 + $0xa8] sm:$0xff] %v1812_v19  ;;  %v1833_v18 = vadd.f32 %v2371_v31, %v3279_v36 }
 0x525   :  { %v1824_v6 = vpop.f32.mrf.mxu1 }
 0x526   :  { %1881 = vst [vmem:[%s3417_s8 + $0xd0] sm:$0xff] %v1833_v18  ;;  %v1825_v57 = vadd.f32 %v1824_v6, %v3279_v36 }
 0x527   :  { %v2372_v55 = vpop.f32.mrf.mxu1 }
 0x528   :  { %1879 = vst [vmem:[%s3417_s8 + $0xc0] sm:$0xff] %v1825_v57  ;;  %v1836_v7 = vadd.f32 %v2372_v55, %v3279_v36 }
 0x529   :  { %v1827_v39 = vpop.f32.mrf.mxu1 }
 0x52a   :  { %1882 = vst [vmem:[%s3417_s8 + $0xd8] sm:$0xff] %v1836_v7  ;;  %v1828_v58 = vadd.f32 %v1827_v39, %v3279_v36 }
 0x52b   :  { %v2375_v61 = vpop.f32.mrf.mxu1 }
 0x52c   :  { %1880 = vst [vmem:[%s3417_s8 + $0xc8] sm:$0xff] %v1828_v58  ;;  %v1849_v50 = vadd.f32 %v2375_v61, %v3279_v36 }
 0x52d   :  { %v1840_v53 = vpop.f32.mrf.mxu1 }
 0x52e   :  { %1885 = vst [vmem:[%s3417_s8 + $0xf0] sm:$0xff] %v1849_v50  ;;  %v1841_v62 = vadd.f32 %v1840_v53, %v3279_v36 }
 0x52f   :  { %v2376_v28 = vpop.f32.mrf.mxu1 }
 0x530   :  { %1883 = vst [vmem:[%s3417_s8 + $0xe0] sm:$0xff] %v1841_v62  ;;  %v1852_v56 = vadd.f32 %v2376_v28, %v3279_v36 }
 0x531   :  { %v1843_v29 = vpop.f32.mrf.mxu1 }
 0x532   :  { %1886 = vst [vmem:[%s3417_s8 + $0xf8] sm:$0xff] %v1852_v56  ;;  %v1844_v47 = vadd.f32 %v1843_v29, %v3279_v36 }
 0x534   :  { %1884 = vst [vmem:[%s3417_s8 + $0xe8] sm:$0xff] %v1844_v47 }
 0x535   :  { %1891 = vsyncpa [#allocation3], 1 }
 0x536   :  { %1892 = vsyncpa [#allocation5], 1 }

</bundles_post_ra>
